<compile_context>
chip_gen: v5e
topology: v5e:2x2
jax: 0.10.0
libtpu: 0.0.40
codegen_flags: <defaults>
</compile_context>

<pallas_src>
import jax
import jax.numpy as jnp
from jax.experimental import pallas as pl
from jax.experimental.pallas import tpu as pltpu


def _round_up(n: int, m: int) -> int:
    return ((n + m - 1) // m) * m


def accent_classifier_kernel(
    x_ref,
    w1_ref, b1_ref,
    w2_ref, b2_ref,
    w3_ref, b3_ref,
    w4_ref, b4_ref,
    logits_ref, feat_ref,
):
    # bf16 cast folded into the kernel (no wrapper-side cast/pad HBM pass).
    x = x_ref[...].astype(jnp.bfloat16)

    # fc1 + ReLU (dropout = identity at inference). bf16 MXU, f32 epilogue.
    h = jnp.dot(x, w1_ref[...], preferred_element_type=jnp.float32)
    h = jnp.maximum(h + b1_ref[...], 0.0)

    # fc2 + ReLU
    h = jnp.dot(h.astype(jnp.bfloat16), w2_ref[...],
                preferred_element_type=jnp.float32)
    h = jnp.maximum(h + b2_ref[...], 0.0)

    # fc3 + ReLU -> accent_feature (returned before dropout)
    feat = jnp.dot(h.astype(jnp.bfloat16), w3_ref[...],
                   preferred_element_type=jnp.float32)
    feat = jnp.maximum(feat + b3_ref[...], 0.0)
    feat_ref[...] = feat.astype(feat_ref.dtype)

    # output_layer (no activation), lane-padded N for unmasked stores.
    logits = jnp.dot(feat.astype(jnp.bfloat16), w4_ref[...],
                     preferred_element_type=jnp.float32)
    logits_ref[...] = (logits + b4_ref[...]).astype(logits_ref.dtype)


def accent_classifier_forward(x, params, *, tm=1024, out_dtype=jnp.float32):
    """x: (..., hidden). Returns (logits, accent_feature) in `out_dtype`."""
    orig_shape = x.shape
    hidden = orig_shape[-1]
    x2d = x.reshape(-1, hidden)            # no cast / no pad: streamed as-is
    M = x2d.shape[0]

    (w1, b1), (w2, b2), (w3, b3), (w4, b4) = params
    num_labels = w4.shape[1]
    d1, d2, d3 = w1.shape[1], w2.shape[1], w3.shape[1]   # 768, 512, 256

    # Only the tiny output layer gets lane padding (unmasked vst on logits).
    np_ = _round_up(num_labels, 128)

    # Clamp the row tile for small/ragged M -> no garbage-row MXU work; cdiv
    # grid means no row padding of x is ever materialized.
    tm_eff = max(8, min(tm, _round_up(M, 8)))
    num_tiles = pl.cdiv(M, tm_eff)
    grid = (num_tiles,)

    # Weights cast to bf16 in the wrapper (tiny, grid-invariant, halves their
    # VMEM-resident footprint); biases stay f32 for the f32 epilogue.
    w1_b = w1.astype(jnp.bfloat16)
    w2_b = w2.astype(jnp.bfloat16)
    w3_b = w3.astype(jnp.bfloat16)
    w4_b = jnp.pad(w4.astype(jnp.bfloat16), ((0, 0), (0, np_ - num_labels)))
    b1_f = b1.astype(jnp.float32)
    b2_f = b2.astype(jnp.float32)
    b3_f = b3.astype(jnp.float32)
    b4_f = jnp.pad(b4.astype(jnp.float32), ((0, 0), (0, np_ - num_labels)))

    def row_map(i):
        return (i, 0)

    def const_map(i):       # grid-invariant: DMA'd once, stays in VMEM
        return (0, 0)

    in_specs = [
        pl.BlockSpec((tm_eff, hidden), row_map),   # x row-tile (double-buffered)
        pl.BlockSpec((hidden, d1), const_map),     # w1 (full-extent K, no pad)
        pl.BlockSpec((1, d1), const_map),          # b1
        pl.BlockSpec((d1, d2), const_map),         # w2
        pl.BlockSpec((1, d2), const_map),          # b2
        pl.BlockSpec((d2, d3), const_map),         # w3
        pl.BlockSpec((1, d3), const_map),          # b3
        pl.BlockSpec((d3, np_), const_map),        # w4 (N padded to 128)
        pl.BlockSpec((1, np_), const_map),         # b4 (N padded to 128)
    ]
    out_specs = (
        pl.BlockSpec((tm_eff, np_), row_map),      # logits (lane-dense)
        pl.BlockSpec((tm_eff, d3), row_map),       # accent_feature
    )

    # Megacore: real 2-TC sharding on v7x only when the grid can be split
    # evenly; otherwise the plain parallel semantic (harmless on 1-TC chips).
    kind = jax.devices()[0].device_kind.lower()
    is_v7 = "v7" in kind
    if is_v7 and num_tiles >= 2 and num_tiles % 2 == 0:
        dim_sem = (pltpu.CORE_PARALLEL,)
    else:
        dim_sem = ("parallel",)
    vmem_limit = (36 << 20) if is_v7 else (48 << 20)

    out_isz = jnp.dtype(out_dtype).itemsize
    flops = 2 * M * (hidden * d1 + d1 * d2 + d2 * d3 + d3 * np_)
    bytes_accessed = (
        x2d.size * jnp.dtype(x2d.dtype).itemsize
        + (w1_b.size + w2_b.size + w3_b.size + w4_b.size) * 2
        + (b1_f.size + b2_f.size + b3_f.size + b4_f.size) * 4
        + M * np_ * out_isz + M * d3 * out_isz
    )

    logits_p, feat = pl.pallas_call(
        accent_classifier_kernel,
        out_shape=(
            jax.ShapeDtypeStruct((M, np_), out_dtype),
            jax.ShapeDtypeStruct((M, d3), out_dtype),
        ),
        grid_spec=pltpu.PrefetchScalarGridSpec(
            num_scalar_prefetch=0,
            grid=grid,
            in_specs=in_specs,
            out_specs=out_specs,
        ),
        compiler_params=pltpu.CompilerParams(
            dimension_semantics=dim_sem,
            vmem_limit_bytes=vmem_limit,
        ),
        cost_estimate=pl.CostEstimate(
            flops=flops, transcendentals=0, bytes_accessed=bytes_accessed),
    )(x2d, w1_b, b1_f, w2_b, b2_f, w3_b, b3_f, w4_b, b4_f)

    logits = logits_p[:, :num_labels].reshape(orig_shape[:-1] + (num_labels,))
    accent_feature = feat.reshape(orig_shape[:-1] + (d3,))
    return logits, accent_feature


def init_params(key, hidden_size, num_labels):
    """Deterministic PyTorch-style (uniform +-1/sqrt(fan_in)) init.
    Weights stored as (in_features, out_features); biases as (1, out)."""
    dims = [(hidden_size, 768), (768, 512), (512, 256), (256, num_labels)]
    params = []
    for (fan_in, fan_out) in dims:
        key, kw, kb = jax.random.split(key, 3)
        bound = 1.0 / jnp.sqrt(fan_in)
        w = jax.random.uniform(kw, (fan_in, fan_out), jnp.float32, -bound, bound)
        b = jax.random.uniform(kb, (1, fan_out), jnp.float32, -bound, bound)
        params.append((w, b))
    return params


def reference_forward_f32(x, params):
    """Pure-JAX f32 reference of the PyTorch forward (eval mode)."""
    (w1, b1), (w2, b2), (w3, b3), (w4, b4) = params
    h = jax.nn.relu(x @ w1 + b1[0])
    h = jax.nn.relu(h @ w2 + b2[0])
    feat = jax.nn.relu(h @ w3 + b3[0])
    logits = feat @ w4 + b4[0]
    return logits, feat


def reference_forward_bf16(x, params):
    """Reference matching the kernel's mixed precision (bf16 MXU, f32 acc)."""
    def mm(a, w):
        return jnp.dot(a.astype(jnp.bfloat16), w.astype(jnp.bfloat16),
                       preferred_element_type=jnp.float32)
    (w1, b1), (w2, b2), (w3, b3), (w4, b4) = params
    h = jax.nn.relu(mm(x, w1) + b1[0])
    h = jax.nn.relu(mm(h, w2) + b2[0])
    feat = jax.nn.relu(mm(h, w3) + b3[0])
    logits = mm(feat, w4) + b4[0]
    return logits, feat


if __name__ == "__main__":
    key = jax.random.PRNGKey(0)
    batch, seq, hidden_size, num_labels = 2, 8, 32, 16

    kx, kp = jax.random.split(key)
    x = jax.random.normal(kx, (batch, seq, hidden_size), jnp.float32)
    params = init_params(kp, hidden_size, num_labels)

    logits, accent_feature = accent_classifier_forward(x, params)
    jax.block_until_ready((logits, accent_feature))

    assert logits.shape == (batch, seq, num_labels)
    assert accent_feature.shape == (batch, seq, 256)

    # Tight check vs a reference with the same mixed precision as the kernel.
    ref_logits_mp, ref_feat_mp = reference_forward_bf16(x, params)
    assert jnp.allclose(logits, ref_logits_mp, atol=2e-3, rtol=2e-3)
    assert jnp.allclose(accent_feature, ref_feat_mp, atol=2e-3, rtol=2e-3)

    # Loose check vs full-f32 PyTorch semantics (bf16 MXU operand noise only).
    ref_logits, ref_feat = reference_forward_f32(x, params)
    assert jnp.allclose(logits, ref_logits, atol=5e-2, rtol=5e-2)
    assert jnp.allclose(accent_feature, ref_feat, atol=5e-2, rtol=5e-2)

    print("KERNEL_OK")
</pallas_src>

<mosaic_0001>
module attributes {stable_mosaic.version = 11 : i64} {
  func.func @accent_classifier_kernel(%arg0: i32, %arg1: memref<16x32xf32, #tpu.memory_space<vmem>>, %arg2: memref<32x768xbf16, #tpu.memory_space<vmem>>, %arg3: memref<1x768xf32, #tpu.memory_space<vmem>>, %arg4: memref<768x512xbf16, #tpu.memory_space<vmem>>, %arg5: memref<1x512xf32, #tpu.memory_space<vmem>>, %arg6: memref<512x256xbf16, #tpu.memory_space<vmem>>, %arg7: memref<1x256xf32, #tpu.memory_space<vmem>>, %arg8: memref<256x128xbf16, #tpu.memory_space<vmem>>, %arg9: memref<1x128xf32, #tpu.memory_space<vmem>>, %arg10: memref<16x128xf32, #tpu.memory_space<vmem>>, %arg11: memref<16x256xf32, #tpu.memory_space<vmem>>) attributes {dimension_semantics = [#tpu.dimension_semantics<parallel>], iteration_bounds = array<i64: 1>, scalar_prefetch = 0 : i64, scratch_operands = 0 : i64, tpu.core_type = #tpu.core_type<tc>, window_params = [{transform_indices = @transform_0, window_bounds = array<i64: 16, 32>}, {pipeline_mode = #tpu.pipeline_mode<synchronous>, transform_indices = @transform_1, window_bounds = array<i64: 32, 768>}, {pipeline_mode = #tpu.pipeline_mode<synchronous>, transform_indices = @transform_2, window_bounds = array<i64: 1, 768>}, {pipeline_mode = #tpu.pipeline_mode<synchronous>, transform_indices = @transform_3, window_bounds = array<i64: 768, 512>}, {pipeline_mode = #tpu.pipeline_mode<synchronous>, transform_indices = @transform_4, window_bounds = array<i64: 1, 512>}, {pipeline_mode = #tpu.pipeline_mode<synchronous>, transform_indices = @transform_5, window_bounds = array<i64: 512, 256>}, {pipeline_mode = #tpu.pipeline_mode<synchronous>, transform_indices = @transform_6, window_bounds = array<i64: 1, 256>}, {pipeline_mode = #tpu.pipeline_mode<synchronous>, transform_indices = @transform_7, window_bounds = array<i64: 256, 128>}, {pipeline_mode = #tpu.pipeline_mode<synchronous>, transform_indices = @transform_8, window_bounds = array<i64: 1, 128>}, {transform_indices = @transform_9, window_bounds = array<i64: 16, 128>}, {transform_indices = @transform_10, window_bounds = array<i64: 16, 256>}]} {
    %c0 = arith.constant 0 : index
    %c0_0 = arith.constant 0 : index
    %0 = vector.load %arg1[%c0, %c0_0] : memref<16x32xf32, #tpu.memory_space<vmem>>, vector<16x32xf32>
    %1 = arith.truncf %0 : vector<16x32xf32> to vector<16x32xbf16>
    %c0_1 = arith.constant 0 : index
    %c0_2 = arith.constant 0 : index
    %2 = vector.load %arg2[%c0_1, %c0_2] : memref<32x768xbf16, #tpu.memory_space<vmem>>, vector<32x768xbf16>
    %cst = arith.constant dense<0.000000e+00> : vector<16x768xf32>
    %3 = tpu.matmul %1, %2, %cst {dimension_numbers = #tpu.dot_dimension_numbers<[1], [0], [0], [1], [0, 0, 1, 1], [], []>} : vector<16x32xbf16>, vector<32x768xbf16>, vector<16x768xf32> -> vector<16x768xf32>
    %c0_3 = arith.constant 0 : index
    %c0_4 = arith.constant 0 : index
    %4 = vector.load %arg3[%c0_3, %c0_4] : memref<1x768xf32, #tpu.memory_space<vmem>>, vector<1x768xf32>
    %5 = vector.broadcast %4 : vector<1x768xf32> to vector<16x768xf32>
    %6 = arith.addf %3, %5 : vector<16x768xf32>
    %cst_5 = arith.constant 0.000000e+00 : f32
    %7 = vector.broadcast %cst_5 : f32 to vector<16x768xf32>
    %8 = arith.maximumf %6, %7 : vector<16x768xf32>
    %9 = arith.truncf %8 : vector<16x768xf32> to vector<16x768xbf16>
    %c0_6 = arith.constant 0 : index
    %c0_7 = arith.constant 0 : index
    %10 = vector.load %arg4[%c0_6, %c0_7] : memref<768x512xbf16, #tpu.memory_space<vmem>>, vector<768x512xbf16>
    %cst_8 = arith.constant dense<0.000000e+00> : vector<16x512xf32>
    %11 = tpu.matmul %9, %10, %cst_8 {dimension_numbers = #tpu.dot_dimension_numbers<[1], [0], [0], [1], [0, 0, 1, 1], [], []>} : vector<16x768xbf16>, vector<768x512xbf16>, vector<16x512xf32> -> vector<16x512xf32>
    %c0_9 = arith.constant 0 : index
    %c0_10 = arith.constant 0 : index
    %12 = vector.load %arg5[%c0_9, %c0_10] : memref<1x512xf32, #tpu.memory_space<vmem>>, vector<1x512xf32>
    %13 = vector.broadcast %12 : vector<1x512xf32> to vector<16x512xf32>
    %14 = arith.addf %11, %13 : vector<16x512xf32>
    %cst_11 = arith.constant 0.000000e+00 : f32
    %15 = vector.broadcast %cst_11 : f32 to vector<16x512xf32>
    %16 = arith.maximumf %14, %15 : vector<16x512xf32>
    %17 = arith.truncf %16 : vector<16x512xf32> to vector<16x512xbf16>
    %c0_12 = arith.constant 0 : index
    %c0_13 = arith.constant 0 : index
    %18 = vector.load %arg6[%c0_12, %c0_13] : memref<512x256xbf16, #tpu.memory_space<vmem>>, vector<512x256xbf16>
    %cst_14 = arith.constant dense<0.000000e+00> : vector<16x256xf32>
    %19 = tpu.matmul %17, %18, %cst_14 {dimension_numbers = #tpu.dot_dimension_numbers<[1], [0], [0], [1], [0, 0, 1, 1], [], []>} : vector<16x512xbf16>, vector<512x256xbf16>, vector<16x256xf32> -> vector<16x256xf32>
    %c0_15 = arith.constant 0 : index
    %c0_16 = arith.constant 0 : index
    %20 = vector.load %arg7[%c0_15, %c0_16] : memref<1x256xf32, #tpu.memory_space<vmem>>, vector<1x256xf32>
    %21 = vector.broadcast %20 : vector<1x256xf32> to vector<16x256xf32>
    %22 = arith.addf %19, %21 : vector<16x256xf32>
    %cst_17 = arith.constant 0.000000e+00 : f32
    %23 = vector.broadcast %cst_17 : f32 to vector<16x256xf32>
    %24 = arith.maximumf %22, %23 : vector<16x256xf32>
    %c0_18 = arith.constant 0 : index
    %c0_19 = arith.constant 0 : index
    %25 = vector.load %arg11[%c0_18, %c0_19] : memref<16x256xf32, #tpu.memory_space<vmem>>, vector<16x256xf32>
    tpu.vector_store %arg11[%c0_18, %c0_19], %24 {strides = array<i32>} : memref<16x256xf32, #tpu.memory_space<vmem>>, vector<16x256xf32>,
    %26 = arith.truncf %24 : vector<16x256xf32> to vector<16x256xbf16>
    %c0_20 = arith.constant 0 : index
    %c0_21 = arith.constant 0 : index
    %27 = vector.load %arg8[%c0_20, %c0_21] : memref<256x128xbf16, #tpu.memory_space<vmem>>, vector<256x128xbf16>
    %cst_22 = arith.constant dense<0.000000e+00> : vector<16x128xf32>
    %28 = tpu.matmul %26, %27, %cst_22 {dimension_numbers = #tpu.dot_dimension_numbers<[1], [0], [0], [1], [0, 0, 1, 1], [], []>} : vector<16x256xbf16>, vector<256x128xbf16>, vector<16x128xf32> -> vector<16x128xf32>
    %c0_23 = arith.constant 0 : index
    %c0_24 = arith.constant 0 : index
    %29 = vector.load %arg9[%c0_23, %c0_24] : memref<1x128xf32, #tpu.memory_space<vmem>>, vector<1x128xf32>
    %30 = vector.broadcast %29 : vector<1x128xf32> to vector<16x128xf32>
    %31 = arith.addf %28, %30 : vector<16x128xf32>
    %c0_25 = arith.constant 0 : index
    %c0_26 = arith.constant 0 : index
    %32 = vector.load %arg10[%c0_25, %c0_26] : memref<16x128xf32, #tpu.memory_space<vmem>>, vector<16x128xf32>
    tpu.vector_store %arg10[%c0_25, %c0_26], %31 {strides = array<i32>} : memref<16x128xf32, #tpu.memory_space<vmem>>, vector<16x128xf32>,
    return
  }
  func.func @transform_0(%arg0: i32) -> (i32, i32) {
    %c0_i32 = arith.constant 0 : i32
    %c0_i32_0 = arith.constant 0 : i32
    return %arg0, %c0_i32 : i32, i32
  }
  func.func @transform_1(%arg0: i32) -> (i32, i32) {
    %c0_i32 = arith.constant 0 : i32
    %c0_i32_0 = arith.constant 0 : i32
    %c0_i32_1 = arith.constant 0 : i32
    return %c0_i32, %c0_i32_0 : i32, i32
  }
  func.func @transform_2(%arg0: i32) -> (i32, i32) {
    %c0_i32 = arith.constant 0 : i32
    %c0_i32_0 = arith.constant 0 : i32
    %c0_i32_1 = arith.constant 0 : i32
    return %c0_i32, %c0_i32_0 : i32, i32
  }
  func.func @transform_3(%arg0: i32) -> (i32, i32) {
    %c0_i32 = arith.constant 0 : i32
    %c0_i32_0 = arith.constant 0 : i32
    %c0_i32_1 = arith.constant 0 : i32
    return %c0_i32, %c0_i32_0 : i32, i32
  }
  func.func @transform_4(%arg0: i32) -> (i32, i32) {
    %c0_i32 = arith.constant 0 : i32
    %c0_i32_0 = arith.constant 0 : i32
    %c0_i32_1 = arith.constant 0 : i32
    return %c0_i32, %c0_i32_0 : i32, i32
  }
  func.func @transform_5(%arg0: i32) -> (i32, i32) {
    %c0_i32 = arith.constant 0 : i32
    %c0_i32_0 = arith.constant 0 : i32
    %c0_i32_1 = arith.constant 0 : i32
    return %c0_i32, %c0_i32_0 : i32, i32
  }
  func.func @transform_6(%arg0: i32) -> (i32, i32) {
    %c0_i32 = arith.constant 0 : i32
    %c0_i32_0 = arith.constant 0 : i32
    %c0_i32_1 = arith.constant 0 : i32
    return %c0_i32, %c0_i32_0 : i32, i32
  }
  func.func @transform_7(%arg0: i32) -> (i32, i32) {
    %c0_i32 = arith.constant 0 : i32
    %c0_i32_0 = arith.constant 0 : i32
    %c0_i32_1 = arith.constant 0 : i32
    return %c0_i32, %c0_i32_0 : i32, i32
  }
  func.func @transform_8(%arg0: i32) -> (i32, i32) {
    %c0_i32 = arith.constant 0 : i32
    %c0_i32_0 = arith.constant 0 : i32
    %c0_i32_1 = arith.constant 0 : i32
    return %c0_i32, %c0_i32_0 : i32, i32
  }
  func.func @transform_9(%arg0: i32) -> (i32, i32) {
    %c0_i32 = arith.constant 0 : i32
    %c0_i32_0 = arith.constant 0 : i32
    return %arg0, %c0_i32 : i32, i32
  }
  func.func @transform_10(%arg0: i32) -> (i32, i32) {
    %c0_i32 = arith.constant 0 : i32
    %c0_i32_0 = arith.constant 0 : i32
    return %arg0, %c0_i32 : i32, i32
  }
}

</mosaic_0001>

<bundles_post_ra>
// kernel: tpu_custom_call.1
= control target key start
LH: loop header
LB: loop body
LE: loop exit
PB: predicated region body
PF: predicated region fallthrough
CT: control target
= control target key end

     0   :  { %16 = vsyncpa [#allocation3], 0  ;;  %s4417_s0 = inlined_call_operand.hbm [shape: f32[16,32], index: 0, kind: input, shape index: {}]   ;;  %s4418_s1 = inlined_call_operand.hbm [shape: bf16[32,768], index: 1, kind: input, shape index: {}]   ;;  %s4419_s2 = inlined_call_operand.hbm [shape: f32[1,768], index: 2, kind: input, shape index: {}]   ;;  %s4420_s3 = inlined_call_operand.hbm [shape: bf16[768,512], index: 3, kind: input, shape index: {}]   ;;  %s4421_s4 = inlined_call_operand.hbm [shape: f32[1,512], index: 4, kind: input, shape index: {}]   ;;  %s4422_s5 = inlined_call_operand.hbm [shape: bf16[512,256], index: 5, kind: input, shape index: {}]   ;;  %s4423_s6 = inlined_call_operand.vmem [shape: f32[1,256], index: 6, kind: input, shape index: {}]   ;;  %s4424_s7 = inlined_call_operand.hbm [shape: bf16[256,128], index: 7, kind: input, shape index: {}]   ;;  %s4425_s8 = inlined_call_operand.vmem [shape: f32[1,128], index: 8, kind: input, shape index: {}]   ;;  %s4426_s9 = inlined_call_operand.hbm [shape: f32[16,128], index: 9, kind: output, shape index: {0}]   ;;  %s4427_s10 = inlined_call_operand.hbm [shape: f32[16,256], index: 10, kind: output, shape index: {1}]  }
   0x1   :  { %17 = vsyncpa [#allocation6], 0 }
   0x2   :  { %18 = vsyncpa [#allocation9], 0 }
   0x3   :  { %19 = vsyncpa [#allocation12], 0 }
   0x4   :  { %20 = vsyncpa [#allocation4], 0  ;;  %s39_s15 = sshll.u32 %s4418_s1, 4  ;;  %s40_s15 = int_to_ptr.hbm [resolvable:$true] %s39_s15 }
   0x5   :  { %21 = vsyncpa [#allocation16], 0  ;;  %s4233_s16 = smov [#allocation5]   ;;  %s63_s20 = sshll.u32 %s4420_s3, 4  ;;  %s64_s20 = int_to_ptr.hbm [resolvable:$true] %s63_s20 }
   0x6   :  { %s41_s17 = sshll.u32 %s4233_s16, 4  ;;  %s4234_s21 = smov 384   ;;  %s42_s17 = int_to_ptr.vmem [resolvable:$true] %s41_s17 }
   0x7   :  { %s4235_s22 = smov 24   ;;  %s4236_s23 = smov [#allocation8]  }
   0x8   :  { %47 = dma.hbm_to_vmem [thread:$0]  %s40_s15, 1536, %s42_s17, [#allocation6], %s4234_s21, %s4234_s21, %s4235_s22  }
   0x9   :  { %s65_s24 = sshll.u32 %s4236_s23, 4  ;;  %s4237_s25 = smov 256   ;;  %s66_s24 = int_to_ptr.vmem [resolvable:$true] %s65_s24 }
   0xa   :  { %s4238_s26 = smov 16   ;;  %s87_s28 = sshll.u32 %s4422_s5, 4  ;;  %s88_s28 = int_to_ptr.hbm [resolvable:$true] %s87_s28 }
   0xb   :  { %71 = dma.hbm_to_vmem [thread:$0]  %s64_s20, 24576, %s66_s24, [#allocation9], %s4237_s25, %s4237_s25, %s4238_s26  }
   0xc   :  { %s4239_s29 = smov [#allocation11]   ;;  %s26_s12 = sshll.u32 %s4417_s0, 4  ;;  %s27_s12 = int_to_ptr.hbm [resolvable:$true] %s26_s12 }
   0xd   :  { %s89_s3 = sshll.u32 %s4239_s29, 4  ;;  %s4240_s13 = smov 128   ;;  %s90_s3 = int_to_ptr.vmem [resolvable:$true] %s89_s3 }
   0xe   :  { %s4241_s14 = smov 8   ;;  %s4242_s15 = smov [#allocation2]  }
   0xf   :  { %95 = dma.hbm_to_vmem [thread:$0]  %s88_s28, 8192, %s90_s3, [#allocation12], %s4240_s13, %s4240_s13, %s4241_s14  }
  0x10   :  { %s28_s16 = sshll.u32 %s4242_s15, 4  ;;  %s53_s5 = sshll.u32 %s4419_s2, 4  ;;  %s29_s16 = int_to_ptr.vmem [resolvable:$true] %s28_s16  ;;  %s54_s5 = int_to_ptr.hbm [resolvable:$true] %s53_s5 }
  0x11   :  { %34 = dma.hbm_to_vmem [thread:$0]  %s27_s12, 256, %s29_s16, [#allocation3], %s4240_s13, %s4240_s13, %s4241_s14  }
  0x12   :  { %s77_s20 = sshll.u32 %s4421_s4, 4  ;;  %s4243_s21 = smov [#allocation7]   ;;  %s78_s20 = int_to_ptr.hbm [resolvable:$true] %s77_s20 }
  0x13   :  { %s55_s22 = sshll.u32 %s4243_s21, 4  ;;  %s4244_s23 = smov [#allocation10]   ;;  %s56_s22 = int_to_ptr.vmem [resolvable:$true] %s55_s22 }
  0x14   :  { %58 = dma.hbm_to_vmem [thread:$0]  %s54_s5, 96, %s56_s22, [#allocation6]  }
  0x15   :  { %s79_s24 = sshll.u32 %s4244_s23, 4  ;;  %s102_s2 = sshll.u32 %s4424_s7, 4  ;;  %s80_s24 = int_to_ptr.vmem [resolvable:$true] %s79_s24  ;;  %s103_s2 = int_to_ptr.hbm [resolvable:$true] %s102_s2 }
  0x16   :  { %82 = dma.hbm_to_vmem [thread:$0]  %s78_s20, 64, %s80_s24, [#allocation9]  }
  0x17   :  { %s4245_s28 = smov [#allocation13]   ;;  %s4246_s3 = smov 64  }
  0x18   :  { %s104_s29 = sshll.u32 %s4245_s28, 4  ;;  %s4247_s30 = smov 4   ;;  %s105_s29 = int_to_ptr.vmem [resolvable:$true] %s104_s29 }
  0x19   :  { %110 = dma.hbm_to_vmem [thread:$0]  %s103_s2, 2048, %s105_s29, [#allocation12], %s4246_s3, %s4246_s3, %s4247_s30  }
  0x1a   :  { %4221 = dma.done.wait [#allocation3], 256  }
  0x1b   :  { %4222 = vsyncadd [#allocation3], 4294967040 }
  0x1c   :  { %4223 = dma.done.wait [#allocation6], 1632  }
  0x1d   :  { %4224 = vsyncadd [#allocation6], 4294965664 }
  0x1e   :  { %4225 = dma.done.wait [#allocation9], 24640  }
  0x1f   :  { %4226 = vsyncadd [#allocation9], 4294942656 }
  0x20   :  { %4227 = dma.done.wait [#allocation12], 10240  }
  0x21   :  { %4228 = vsyncadd [#allocation12], 4294957056  ;;  %v2587_v0 = vld [vmem:[#allocation5 + $0x30] sm:$0xf]  ;;  %v3712_v1 = vld [vmem:[#allocation5 + $0x44] sm:$0xf0] }
  0x22   :  { %v3709_v2 = vld [vmem:[#allocation5 + $0x34] sm:$0xf]  ;;  %v2588_v3 = vor.u32 %v3712_v1, %v2587_v0  ;;  %v2589_v4 = vld [vmem:[#allocation5 + $0x48] sm:$0xf0]  ;;  %v2595_v5 = vld [vmem:[#allocation5 + $0x38] sm:$0xf] }
  0x23   :  { %v3713_v6 = vld [vmem:[#allocation5 + $0x4c] sm:$0xf0]  ;;  %v2592_v7 = vor.u32 %v3709_v2, %v2589_v4  ;;  %v3710_v9 = vld [vmem:[#allocation5 + $0x3c] sm:$0xf]  ;;  %v2597_v10 = vld [vmem:[#allocation5 + $0x50] sm:$0xf0] }
  0x24   :  { %v2596_v8 = vor.u32 %v3713_v6, %v2595_v5  ;;  %v2563_v11 = vld [vmem:[#allocation5] sm:$0xf]  ;;  %241 = vmatpush.bf16.msra.mxu0 %v2588_v3  ;;  %v2600_v12 = vor.u32 %v3710_v9, %v2597_v10  ;;  %v3706_v13 = vld [vmem:[#allocation5 + $0x14] sm:$0xf0]  ;;  %v3703_v14 = vld [vmem:[#allocation5 + $0x4] sm:$0xf] }
  0x25   :  { %v2565_v15 = vld [vmem:[#allocation5 + $0x18] sm:$0xf0]  ;;  %255 = vmatpush.bf16.msra.mxu1 %v2592_v7  ;;  %v2564_v16 = vor.u32 %v3706_v13, %v2563_v11  ;;  %v2571_v18 = vld [vmem:[#allocation5 + $0x8] sm:$0xf]  ;;  %v3707_v19 = vld [vmem:[#allocation5 + $0x1c] sm:$0xf0] }
  0x26   :  { %269 = vmatpush.bf16.msra.mxu2 %v2596_v8  ;;  %v2568_v17 = vor.u32 %v3703_v14, %v2565_v15  ;;  %v3704_v20 = vld [vmem:[#allocation5 + $0xc] sm:$0xf]  ;;  %283 = vmatpush.bf16.msra.mxu3 %v2600_v12  ;;  %v2572_v21 = vor.u32 %v3707_v19, %v2571_v18  ;;  %v2573_v22 = vld [vmem:[#allocation5 + $0x20] sm:$0xf0]  ;;  %v142_v23 = vld [vmem:[#allocation2] sm:$0xff]  ;;  %vm231_vm0 = vcmask 261120  }
  0x27   :  { %v143_v24 = vld [vmem:[#allocation2 + $0x8] sm:$0xff]  ;;  %v2576_v25 = vor.u32 %v3704_v20, %v2573_v22  ;;  %v2603_v27 = vld [vmem:[#allocation5 + $0x40] sm:$0xf]  ;;  %v3711_v29 = vld [vmem:[#allocation5 + $0x44] sm:$0xf]  ;;  %s2540_s16 = sshll.u32 %s4427_s10, 4  ;;  %s2541_s16 = int_to_ptr.hbm [resolvable:$true] %s2540_s16 }
  0x28   :  { %v4335_v26 = vpack.c.bf16 %v143_v24, %v142_v23  ;;  %v3714_v28 = vld [vmem:[#allocation5 + $0x54] sm:$0xf0]  ;;  %242 = vmatpush.bf16.msra.mxu0 %v2564_v16  ;;  %v2605_v31 = vld [vmem:[#allocation5 + $0x58] sm:$0xf0]  ;;  %v2579_v32 = vld [vmem:[#allocation5 + $0x10] sm:$0xf] }
  0x29   :  { %v2604_v30 = vor.u32 %v3714_v28, %v2603_v27  ;;  %v3708_v33 = vld [vmem:[#allocation5 + $0x24] sm:$0xf0]  ;;  %256 = vmatpush.bf16.msra.mxu1 %v2568_v17  ;;  %v2608_v34 = vor.u32 %v3711_v29, %v2605_v31  ;;  %v3705_v35 = vld [vmem:[#allocation5 + $0x14] sm:$0xf]  ;;  %v2581_v36 = vld [vmem:[#allocation5 + $0x28] sm:$0xf0] }
  0x2a   :  { %270 = vmatpush.bf16.msra.mxu2 %v2572_v21  ;;  %v2729_v37 = vld [vmem:[#allocation8 + $0xe0] sm:$0xf]  ;;  %284 = vmatpush.bf16.msra.mxu3 %v2576_v25  ;;  %v2580_v38 = vor.u32 %v3708_v33, %v2579_v32  ;;  %v3745_v39 = vld [vmem:[#allocation8 + $0xec] sm:$0xf0]  ;;  %v2584_v42 = vor.u32 %v3705_v35, %v2581_v36  ;;  %s4249_s5 = smov [#allocation14]   ;;  %s2527_s20 = sshll.u32 %s4426_s9, 4  ;;  %s2528_s20 = int_to_ptr.hbm [resolvable:$true] %s2527_s20 }
  0x2b   :  { %v2857_v40 = vld [vmem:[#allocation8 + $0x1e0] sm:$0xf]  ;;  %v3777_v41 = vld [vmem:[#allocation8 + $0x1ec] sm:$0xf0]  ;;  %2609 = vmatmul.msk.bf16.vlgmr.msra.gmra.mxu0 %vm231_vm0, %v4335_v26  ;;  %v2730_v43 = vor.u32 %v3745_v39, %v2729_v37  ;;  %s2525_s0 = sshll.u32 %s4249_s5, 4  ;;  %s2526_s0 = int_to_ptr.vmem [resolvable:$true] %s2525_s0 }
  0x2c   :  { %297 = vmatpush.bf16.msrb.mxu0 %v2604_v30  ;;  %v2858_v44 = vor.u32 %v3777_v41, %v2857_v40  ;;  %v2713_v45 = vld [vmem:[#allocation8 + $0xc0] sm:$0xf]  ;;  %v3741_v46 = vld [vmem:[#allocation8 + $0xcc] sm:$0xf0]  ;;  %2610 = vmatmul.msk.bf16.vlgmr.msra.gmra.mxu1 %vm231_vm0, %v4335_v26 }
  0x2d   :  { %311 = vmatpush.bf16.msrb.mxu1 %v2608_v34  ;;  %v2841_v47 = vld [vmem:[#allocation8 + $0x1c0] sm:$0xf]  ;;  %2611 = vmatmul.msk.bf16.vlgmr.msra.gmra.mxu2 %vm231_vm0, %v4335_v26  ;;  %v3773_v48 = vld [vmem:[#allocation8 + $0x1cc] sm:$0xf0]  ;;  %v2714_v51 = vor.u32 %v3741_v46, %v2713_v45 }
  0x2e   :  { %v2985_v49 = vld [vmem:[#allocation8 + $0x2e0] sm:$0xf]  ;;  %v3809_v50 = vld [vmem:[#allocation8 + $0x2ec] sm:$0xf0]  ;;  %2612 = vmatmul.msk.bf16.vlgmr.msra.gmra.mxu3 %vm231_vm0, %v4335_v26  ;;  %1499 = vmatpush.bf16.msrb.mxu2 %v2730_v43  ;;  %v2842_v56 = vor.u32 %v3773_v48, %v2841_v47 }
  0x2f   :  { %v2986_v52 = vor.u32 %v3809_v50, %v2985_v49  ;;  %v3113_v53 = vld [vmem:[#allocation8 + $0x3e0] sm:$0xf]  ;;  %v3841_v54 = vld [vmem:[#allocation8 + $0x3ec] sm:$0xf0]  ;;  %1513 = vmatpush.bf16.msrb.mxu3 %v2858_v44 }
  0x30   :  { %v2697_v55 = vld [vmem:[#allocation8 + $0xa0] sm:$0xf]  ;;  %298 = vmatpush.bf16.msrb.mxu0 %v2580_v38  ;;  %v3114_v57 = vor.u32 %v3841_v54, %v3113_v53  ;;  %v3737_v58 = vld [vmem:[#allocation8 + $0xac] sm:$0xf0] }
  0x31   :  { %v2825_v59 = vld [vmem:[#allocation8 + $0x1a0] sm:$0xf]  ;;  %v3769_v60 = vld [vmem:[#allocation8 + $0x1ac] sm:$0xf0]  ;;  %312 = vmatpush.bf16.msrb.mxu1 %v2584_v42  ;;  %v2698_v2 = vor.u32 %v3737_v58, %v2697_v55 }
  0x32   :  { %v2969_v61 = vld [vmem:[#allocation8 + $0x2c0] sm:$0xf]  ;;  %v3805_v62 = vld [vmem:[#allocation8 + $0x2cc] sm:$0xf0]  ;;  %1500 = vmatpush.bf16.msrb.mxu2 %v2714_v51  ;;  %v2826_v7 = vor.u32 %v3769_v60, %v2825_v59 }
  0x33   :  { %v3097_v63 = vld [vmem:[#allocation8 + $0x3c0] sm:$0xf]  ;;  %v2970_v0 = vor.u32 %v3805_v62, %v2969_v61  ;;  %v3837_v1 = vld [vmem:[#allocation8 + $0x3cc] sm:$0xf0]  ;;  %1514 = vmatpush.bf16.msrb.mxu3 %v2842_v56 }
  0x34   :  { %1527 = vmatpush.bf16.msra.mxu0 %v2986_v52  ;;  %v3098_v3 = vor.u32 %v3837_v1, %v3097_v63  ;;  %v2681_v4 = vld [vmem:[#allocation8 + $0x80] sm:$0xf]  ;;  %v3733_v5 = vld [vmem:[#allocation8 + $0x8c] sm:$0xf0] }
  0x35   :  { %1541 = vmatpush.bf16.msra.mxu1 %v3114_v57  ;;  %v2953_v6 = vld [vmem:[#allocation8 + $0x2a0] sm:$0xf]  ;;  %v3801_v8 = vld [vmem:[#allocation8 + $0x2ac] sm:$0xf0]  ;;  %v2682_v15 = vor.u32 %v3733_v5, %v2681_v4 }
  0x36   :  { %v3081_v9 = vld [vmem:[#allocation8 + $0x3a0] sm:$0xf]  ;;  %v3833_v10 = vld [vmem:[#allocation8 + $0x3ac] sm:$0xf0]  ;;  %v2954_v13 = vor.u32 %v3801_v8, %v2953_v6  ;;  %1501 = vmatpush.bf16.msrb.mxu2 %v2698_v2 }
  0x37   :  { %v2809_v11 = vld [vmem:[#allocation8 + $0x180] sm:$0xf]  ;;  %v3765_v12 = vld [vmem:[#allocation8 + $0x18c] sm:$0xf0]  ;;  %v3082_v14 = vor.u32 %v3833_v10, %v3081_v9  ;;  %1515 = vmatpush.bf16.msrb.mxu3 %v2826_v7 }
  0x38   :  { %1528 = vmatpush.bf16.msra.mxu0 %v2970_v0  ;;  %v2665_v16 = vld [vmem:[#allocation8 + $0x60] sm:$0xf]  ;;  %v3797_v18 = vld [vmem:[#allocation8 + $0x28c] sm:$0xf0]  ;;  %v2810_v19 = vor.u32 %v3765_v12, %v2809_v11  ;;  %v3743_v12 = vld [vmem:[#allocation8 + $0xe4] sm:$0xf] }
  0x39   :  { %1542 = vmatpush.bf16.msra.mxu1 %v3098_v3  ;;  %v2937_v17 = vld [vmem:[#allocation8 + $0x280] sm:$0xf]  ;;  %v3729_v20 = vld [vmem:[#allocation8 + $0x6c] sm:$0xf0] }
  0x3a   :  { %v3065_v21 = vld [vmem:[#allocation8 + $0x380] sm:$0xf]  ;;  %v3829_v22 = vld [vmem:[#allocation8 + $0x38c] sm:$0xf0]  ;;  %v2938_v25 = vor.u32 %v3797_v18, %v2937_v17  ;;  %1502 = vmatpush.bf16.msrb.mxu2 %v2682_v15  ;;  %v2666_v27 = vor.u32 %v3729_v20, %v2665_v16  ;;  %v3775_v15 = vld [vmem:[#allocation8 + $0x1e4] sm:$0xf] }
  0x3b   :  { %v2793_v23 = vld [vmem:[#allocation8 + $0x160] sm:$0xf]  ;;  %v3761_v24 = vld [vmem:[#allocation8 + $0x16c] sm:$0xf0]  ;;  %v3066_v28 = vor.u32 %v3829_v22, %v3065_v21  ;;  %1516 = vmatpush.bf16.msrb.mxu3 %v2810_v19  ;;  %2613 = vmatmul.msk.bf16.vlgmr.msrb.gmra.mxu0 %vm231_vm0, %v4335_v26  ;;  %v2859_v16 = vld [vmem:[#allocation8 + $0x1f0] sm:$0xf0] }
  0x3c   :  { %1529 = vmatpush.bf16.msra.mxu0 %v2954_v13  ;;  %v2649_v29 = vld [vmem:[#allocation8 + $0x40] sm:$0xf]  ;;  %v3793_v31 = vld [vmem:[#allocation8 + $0x26c] sm:$0xf0]  ;;  %v2794_v32 = vor.u32 %v3761_v24, %v2793_v23  ;;  %2614 = vmatmul.msk.bf16.vlgmr.msrb.gmra.mxu1 %vm231_vm0, %v4335_v26  ;;  %v2731_v13 = vld [vmem:[#allocation8 + $0xf0] sm:$0xf0]  ;;  %v2862_v23 = vor.u32 %v3775_v15, %v2859_v16 }
  0x3d   :  { %1543 = vmatpush.bf16.msra.mxu1 %v3082_v14  ;;  %v2921_v30 = vld [vmem:[#allocation8 + $0x260] sm:$0xf]  ;;  %v3725_v33 = vld [vmem:[#allocation8 + $0x4c] sm:$0xf0]  ;;  %v2734_v21 = vor.u32 %v3743_v12, %v2731_v13  ;;  %v3723_v15 = vld [vmem:[#allocation8 + $0x44] sm:$0xf] }
  0x3e   :  { %v3049_v34 = vld [vmem:[#allocation8 + $0x360] sm:$0xf]  ;;  %v3825_v35 = vld [vmem:[#allocation8 + $0x36c] sm:$0xf0]  ;;  %v2922_v38 = vor.u32 %v3793_v31, %v2921_v30  ;;  %1503 = vmatpush.bf16.msrb.mxu2 %v2666_v27  ;;  %v2650_v39 = vor.u32 %v3725_v33, %v2649_v29  ;;  %v2715_v27 = vld [vmem:[#allocation8 + $0xd0] sm:$0xf0] }
  0x3f   :  { %v2777_v36 = vld [vmem:[#allocation8 + $0x140] sm:$0xf]  ;;  %v3757_v37 = vld [vmem:[#allocation8 + $0x14c] sm:$0xf0]  ;;  %v3050_v40 = vor.u32 %v3825_v35, %v3049_v34  ;;  %1517 = vmatpush.bf16.msrb.mxu3 %v2794_v32  ;;  %v3771_v30 = vld [vmem:[#allocation8 + $0x1c4] sm:$0xf] }
  0x40   :  { %1530 = vmatpush.bf16.msra.mxu0 %v2938_v25  ;;  %v2633_v41 = vld [vmem:[#allocation8 + $0x20] sm:$0xf]  ;;  %v3789_v43 = vld [vmem:[#allocation8 + $0x24c] sm:$0xf0]  ;;  %v2778_v44 = vor.u32 %v3757_v37, %v2777_v36  ;;  %v3739_v25 = vld [vmem:[#allocation8 + $0xc4] sm:$0xf] }
  0x41   :  { %1544 = vmatpush.bf16.msra.mxu1 %v3066_v28  ;;  %v2905_v42 = vld [vmem:[#allocation8 + $0x240] sm:$0xf]  ;;  %v3721_v45 = vld [vmem:[#allocation8 + $0x2c] sm:$0xf0]  ;;  %v2843_v31 = vld [vmem:[#allocation8 + $0x1d0] sm:$0xf0]  ;;  %v2718_v34 = vor.u32 %v3739_v25, %v2715_v27 }
  0x42   :  { %v3033_v46 = vld [vmem:[#allocation8 + $0x340] sm:$0xf]  ;;  %v3821_v47 = vld [vmem:[#allocation8 + $0x34c] sm:$0xf0]  ;;  %v2906_v50 = vor.u32 %v3789_v43, %v2905_v42  ;;  %1504 = vmatpush.bf16.msrb.mxu2 %v2650_v39  ;;  %v2634_v26 = vor.u32 %v3721_v45, %v2633_v41  ;;  %v2846_v36 = vor.u32 %v3771_v30, %v2843_v31  ;;  %v2699_v45 = vld [vmem:[#allocation8 + $0xb0] sm:$0xf0] }
  0x43   :  { %v2761_v48 = vld [vmem:[#allocation8 + $0x120] sm:$0xf]  ;;  %v3753_v49 = vld [vmem:[#allocation8 + $0x12c] sm:$0xf0]  ;;  %v3034_v52 = vor.u32 %v3821_v47, %v3033_v46  ;;  %1518 = vmatpush.bf16.msrb.mxu3 %v2778_v44  ;;  %v3735_v44 = vld [vmem:[#allocation8 + $0xa4] sm:$0xf] }
  0x44   :  { %1531 = vmatpush.bf16.msra.mxu0 %v2922_v38  ;;  %v2617_v51 = vld [vmem:[#allocation8] sm:$0xf]  ;;  %v3717_v53 = vld [vmem:[#allocation8 + $0xc] sm:$0xf0]  ;;  %v2762_v56 = vor.u32 %v3753_v49, %v2761_v48  ;;  %v3767_v46 = vld [vmem:[#allocation8 + $0x1a4] sm:$0xf]  ;;  %v2702_v47 = vor.u32 %v3735_v44, %v2699_v45 }
  0x45   :  { %1545 = vmatpush.bf16.msra.mxu1 %v3050_v40  ;;  %v2889_v54 = vld [vmem:[#allocation8 + $0x220] sm:$0xf]  ;;  %v3785_v55 = vld [vmem:[#allocation8 + $0x22c] sm:$0xf0]  ;;  %v2618_v2 = vor.u32 %v3717_v53, %v2617_v51  ;;  %v2827_v48 = vld [vmem:[#allocation8 + $0x1b0] sm:$0xf0] }
  0x46   :  { %v2745_v57 = vld [vmem:[#allocation8 + $0x100] sm:$0xf]  ;;  %v3817_v59 = vld [vmem:[#allocation8 + $0x32c] sm:$0xf0]  ;;  %v2890_v1 = vor.u32 %v3785_v55, %v2889_v54  ;;  %1505 = vmatpush.bf16.msrb.mxu2 %v2634_v26  ;;  %v2830_v49 = vor.u32 %v3767_v46, %v2827_v48  ;;  %v3731_v55 = vld [vmem:[#allocation8 + $0x84] sm:$0xf] }
  0x47   :  { %v3017_v58 = vld [vmem:[#allocation8 + $0x320] sm:$0xf]  ;;  %v3749_v60 = vld [vmem:[#allocation8 + $0x10c] sm:$0xf0]  ;;  %1519 = vmatpush.bf16.msrb.mxu3 %v2762_v56  ;;  %v2683_v56 = vld [vmem:[#allocation8 + $0x90] sm:$0xf0] }
  0x48   :  { %v3241_v61 = vld [vmem:[#allocation8 + $0x4e0] sm:$0xf]  ;;  %v3873_v62 = vld [vmem:[#allocation8 + $0x4ec] sm:$0xf0]  ;;  %1532 = vmatpush.bf16.msra.mxu0 %v2906_v50  ;;  %v3018_v3 = vor.u32 %v3817_v59, %v3017_v58  ;;  %v2746_v9 = vor.u32 %v3749_v60, %v2745_v57  ;;  %v2686_v57 = vor.u32 %v3731_v55, %v2683_v56  ;;  %v3763_v58 = vld [vmem:[#allocation8 + $0x184] sm:$0xf] }
  0x49   :  { %v3369_v63 = vld [vmem:[#allocation8 + $0x5e0] sm:$0xf]  ;;  %v3905_v0 = vld [vmem:[#allocation8 + $0x5ec] sm:$0xf0]  ;;  %1546 = vmatpush.bf16.msra.mxu1 %v3034_v52  ;;  %v3242_v10 = vor.u32 %v3873_v62, %v3241_v61  ;;  %v2811_v59 = vld [vmem:[#allocation8 + $0x190] sm:$0xf0] }
  0x4a   :  { %v3225_v4 = vld [vmem:[#allocation8 + $0x4c0] sm:$0xf]  ;;  %v3869_v5 = vld [vmem:[#allocation8 + $0x4cc] sm:$0xf0]  ;;  %v3370_v14 = vor.u32 %v3905_v0, %v3369_v63  ;;  %1506 = vmatpush.bf16.msrb.mxu2 %v2618_v2  ;;  %v2814_v60 = vor.u32 %v3763_v58, %v2811_v59  ;;  %v2651_v16 = vld [vmem:[#allocation8 + $0x50] sm:$0xf0] }
  0x4b   :  { %v2873_v6 = vld [vmem:[#allocation8 + $0x200] sm:$0xf]  ;;  %v3781_v7 = vld [vmem:[#allocation8 + $0x20c] sm:$0xf0]  ;;  %1520 = vmatpush.bf16.msrb.mxu3 %v2746_v9  ;;  %v3226_v22 = vor.u32 %v3869_v5, %v3225_v4  ;;  %v2667_v4 = vld [vmem:[#allocation8 + $0x70] sm:$0xf0] }
  0x4c   :  { %v3001_v8 = vld [vmem:[#allocation8 + $0x300] sm:$0xf]  ;;  %v3813_v11 = vld [vmem:[#allocation8 + $0x30c] sm:$0xf0]  ;;  %1533 = vmatpush.bf16.msra.mxu0 %v2890_v1  ;;  %v2874_v19 = vor.u32 %v3781_v7, %v2873_v6  ;;  %v3759_v5 = vld [vmem:[#allocation8 + $0x164] sm:$0xf] }
  0x4d   :  { %v3353_v17 = vld [vmem:[#allocation8 + $0x5c0] sm:$0xf]  ;;  %v3901_v18 = vld [vmem:[#allocation8 + $0x5cc] sm:$0xf0]  ;;  %1547 = vmatpush.bf16.msra.mxu1 %v3018_v3  ;;  %v3002_v20 = vor.u32 %v3813_v11, %v3001_v8  ;;  %v3727_v3 = vld [vmem:[#allocation8 + $0x64] sm:$0xf] }
  0x4e   :  { %1555 = vmatpush.bf16.msra.mxu2 %v3242_v10  ;;  %v3209_v24 = vld [vmem:[#allocation8 + $0x4a0] sm:$0xf]  ;;  %v3354_v28 = vor.u32 %v3901_v18, %v3353_v17  ;;  %v3865_v29 = vld [vmem:[#allocation8 + $0x4ac] sm:$0xf0]  ;;  %v2670_v6 = vor.u32 %v3727_v3, %v2667_v4  ;;  %v2795_v7 = vld [vmem:[#allocation8 + $0x170] sm:$0xf0]  ;;  %v2654_v18 = vor.u32 %v3723_v15, %v2651_v16 }
  0x4f   :  { %1569 = vmatpush.bf16.msra.mxu3 %v3370_v14  ;;  %v3337_v32 = vld [vmem:[#allocation8 + $0x5a0] sm:$0xf]  ;;  %v3897_v33 = vld [vmem:[#allocation8 + $0x5ac] sm:$0xf0]  ;;  %v3210_v35 = vor.u32 %v3865_v29, %v3209_v24  ;;  %v2798_v8 = vor.u32 %v3759_v5, %v2795_v7  ;;  %v3755_v17 = vld [vmem:[#allocation8 + $0x144] sm:$0xf] }
  0x50   :  { %1534 = vmatpush.bf16.msra.mxu0 %v2874_v19  ;;  %v3338_v37 = vor.u32 %v3897_v33, %v3337_v32  ;;  %v3193_v38 = vld [vmem:[#allocation8 + $0x480] sm:$0xf]  ;;  %v3861_v39 = vld [vmem:[#allocation8 + $0x48c] sm:$0xf0]  ;;  %v2779_v19 = vld [vmem:[#allocation8 + $0x150] sm:$0xf0] }
  0x51   :  { %1548 = vmatpush.bf16.msra.mxu1 %v3002_v20  ;;  %v3321_v40 = vld [vmem:[#allocation8 + $0x580] sm:$0xf]  ;;  %v3893_v41 = vld [vmem:[#allocation8 + $0x58c] sm:$0xf0]  ;;  %v3194_v42 = vor.u32 %v3861_v39, %v3193_v38  ;;  %v2782_v20 = vor.u32 %v3755_v17, %v2779_v19  ;;  %v2635_v29 = vld [vmem:[#allocation8 + $0x30] sm:$0xf0] }
  0x52   :  { %1556 = vmatpush.bf16.msra.mxu2 %v3226_v22  ;;  %v3322_v43 = vor.u32 %v3893_v41, %v3321_v40  ;;  %v3177_v50 = vld [vmem:[#allocation8 + $0x460] sm:$0xf]  ;;  %v3857_v51 = vld [vmem:[#allocation8 + $0x46c] sm:$0xf0]  ;;  %v3751_v30 = vld [vmem:[#allocation8 + $0x124] sm:$0xf] }
  0x53   :  { %1570 = vmatpush.bf16.msra.mxu3 %v3354_v28  ;;  %v3305_v26 = vld [vmem:[#allocation8 + $0x560] sm:$0xf]  ;;  %v3178_v52 = vor.u32 %v3857_v51, %v3177_v50  ;;  %v3889_v53 = vld [vmem:[#allocation8 + $0x56c] sm:$0xf0]  ;;  %v3719_v28 = vld [vmem:[#allocation8 + $0x24] sm:$0xf] }
  0x54   :  { %1583 = vmatpush.bf16.msrb.mxu0 %v2734_v21  ;;  %v3306_v54 = vor.u32 %v3889_v53, %v3305_v26  ;;  %v3161_v61 = vld [vmem:[#allocation8 + $0x440] sm:$0xf]  ;;  %v3853_v62 = vld [vmem:[#allocation8 + $0x44c] sm:$0xf0]  ;;  %v2763_v31 = vld [vmem:[#allocation8 + $0x130] sm:$0xf0]  ;;  %v2638_v32 = vor.u32 %v3719_v28, %v2635_v29 }
  0x55   :  { %1597 = vmatpush.bf16.msrb.mxu1 %v2862_v23  ;;  %v3289_v63 = vld [vmem:[#allocation8 + $0x540] sm:$0xf]  ;;  %v3162_v0 = vor.u32 %v3853_v62, %v3161_v61  ;;  %v3885_v1 = vld [vmem:[#allocation8 + $0x54c] sm:$0xf0]  ;;  %v2766_v33 = vor.u32 %v3751_v30, %v2763_v31  ;;  %v2747_v38 = vld [vmem:[#allocation8 + $0x110] sm:$0xf0] }
  0x56   :  { %1557 = vmatpush.bf16.msra.mxu2 %v3210_v35  ;;  %v3290_v2 = vor.u32 %v3885_v1, %v3289_v63  ;;  %v3145_v9 = vld [vmem:[#allocation8 + $0x420] sm:$0xf]  ;;  %v3849_v10 = vld [vmem:[#allocation8 + $0x42c] sm:$0xf0]  ;;  %v2619_v35 = vld [vmem:[#allocation8 + $0x10] sm:$0xf0] }
  0x57   :  { %1571 = vmatpush.bf16.msra.mxu3 %v3338_v37  ;;  %v3273_v11 = vld [vmem:[#allocation8 + $0x520] sm:$0xf]  ;;  %v3146_v12 = vor.u32 %v3849_v10, %v3145_v9  ;;  %v3881_v13 = vld [vmem:[#allocation8 + $0x52c] sm:$0xf0]  ;;  %v3747_v37 = vld [vmem:[#allocation8 + $0x104] sm:$0xf] }
  0x58   :  { %1584 = vmatpush.bf16.msrb.mxu0 %v2718_v34  ;;  %v3274_v14 = vor.u32 %v3881_v13, %v3273_v11  ;;  %v3129_v21 = vld [vmem:[#allocation8 + $0x400] sm:$0xf]  ;;  %v3845_v22 = vld [vmem:[#allocation8 + $0x40c] sm:$0xf0]  ;;  %v3715_v34 = vld [vmem:[#allocation8 + $0x4] sm:$0xf]  ;;  %v2750_v39 = vor.u32 %v3747_v37, %v2747_v38 }
  0x59   :  { %1598 = vmatpush.bf16.msrb.mxu1 %v2846_v36  ;;  %v3257_v23 = vld [vmem:[#allocation8 + $0x500] sm:$0xf]  ;;  %v3130_v24 = vor.u32 %v3845_v22, %v3129_v21  ;;  %v3877_v25 = vld [vmem:[#allocation8 + $0x50c] sm:$0xf0]  ;;  %v2622_v36 = vor.u32 %v3715_v34, %v2619_v35  ;;  %v4349_v40 = vld [vmem:[#allocation7] sm:$0x3f] }
  0x5a   :  { %1558 = vmatpush.bf16.msra.mxu2 %v3194_v42  ;;  %v3258_v27 = vor.u32 %v3877_v25, %v3257_v23  ;;  %v160_v44 = vperm.slane %v4349_v40, 1  ;;  %v3807_v26 = vld [vmem:[#allocation8 + $0x2e4] sm:$0xf]  ;;  %v161_v53 = vperm.slane %v4349_v40, 2  ;;  %v3115_v56 = vld [vmem:[#allocation8 + $0x3f0] sm:$0xf0] }
  0x5b   :  { %1572 = vmatpush.bf16.msra.mxu3 %v3322_v43  ;;  %v159_v43 = vperm.slane %v4349_v40, 0  ;;  %v3839_v55 = vld [vmem:[#allocation8 + $0x3e4] sm:$0xf]  ;;  %v162_v58 = vperm.slane %v4349_v40, 3  ;;  %v3243_v16 = vld [vmem:[#allocation8 + $0x4f0] sm:$0xf0] }
  0x5c   :  { %1585 = vmatpush.bf16.msrb.mxu0 %v2702_v47  ;;  %v3803_v1 = vld [vmem:[#allocation8 + $0x2c4] sm:$0xf]  ;;  %v3371_v21 = vld [vmem:[#allocation8 + $0x5f0] sm:$0xf0] }
  0x5d   :  { %1599 = vmatpush.bf16.msrb.mxu1 %v2830_v49  ;;  %v3835_v5 = vld [vmem:[#allocation8 + $0x3c4] sm:$0xf]  ;;  %v2955_v23 = vld [vmem:[#allocation8 + $0x2b0] sm:$0xf0] }
  0x5e   :  { %1559 = vmatpush.bf16.msra.mxu2 %v3178_v52  ;;  %v2987_v52 = vld [vmem:[#allocation8 + $0x2f0] sm:$0xf0]  ;;  %v3871_v9 = vld [vmem:[#allocation8 + $0x4e4] sm:$0xf] }
  0x5f   :  { %1573 = vmatpush.bf16.msra.mxu3 %v3306_v54  ;;  %v2990_v62 = vor.u32 %v3807_v26, %v2987_v52  ;;  %v3903_v17 = vld [vmem:[#allocation8 + $0x5e4] sm:$0xf]  ;;  %v3083_v28 = vld [vmem:[#allocation8 + $0x3b0] sm:$0xf0]  ;;  %v3246_v31 = vor.u32 %v3871_v9, %v3243_v16 }
  0x60   :  { %1586 = vmatpush.bf16.msrb.mxu0 %v2686_v57  ;;  %v3799_v22 = vld [vmem:[#allocation8 + $0x2a4] sm:$0xf]  ;;  %v3211_v26 = vld [vmem:[#allocation8 + $0x4b0] sm:$0xf0] }
  0x61   :  { %1600 = vmatpush.bf16.msrb.mxu1 %v2814_v60  ;;  %v2958_v34 = vor.u32 %v3799_v22, %v2955_v23  ;;  %v3867_v35 = vld [vmem:[#allocation8 + $0x4c4] sm:$0xf] }
  0x62   :  { %1560 = vmatpush.bf16.msra.mxu2 %v3162_v0  ;;  %v3118_v0 = vor.u32 %v3839_v55, %v3115_v56  ;;  %v3899_v37 = vld [vmem:[#allocation8 + $0x5c4] sm:$0xf] }
  0x63   :  { %1574 = vmatpush.bf16.msra.mxu3 %v3290_v2  ;;  %v2971_v2 = vld [vmem:[#allocation8 + $0x2d0] sm:$0xf0]  ;;  %v3895_v52 = vld [vmem:[#allocation8 + $0x5a4] sm:$0xf] }
  0x64   :  { %1587 = vmatpush.bf16.msrb.mxu0 %v2670_v6  ;;  %v3099_v6 = vld [vmem:[#allocation8 + $0x3d0] sm:$0xf0]  ;;  %v2974_v15 = vor.u32 %v3803_v1, %v2971_v2  ;;  %v3819_v16 = vld [vmem:[#allocation8 + $0x344] sm:$0xf] }
  0x65   :  { %1601 = vmatpush.bf16.msrb.mxu1 %v2798_v8 }
  0x66   :  { %1561 = vmatpush.bf16.msra.mxu2 %v3146_v12  ;;  %v163_v12 = vperm.slane %v4349_v40, 4 }
  0x67   :  { %1575 = vmatpush.bf16.msra.mxu3 %v3274_v14  ;;  %v164_v14 = vperm.slane %v4349_v40, 5 }
  0x68   :  { %1588 = vmatpush.bf16.msrb.mxu0 %v2654_v18 }
  0x69   :  { %1602 = vmatpush.bf16.msrb.mxu1 %v2782_v20  ;;  %v3102_v20 = vor.u32 %v3835_v5, %v3099_v6  ;;  %v3859_v6 = vld [vmem:[#allocation8 + $0x484] sm:$0xf] }
  0x6a   :  { %1562 = vmatpush.bf16.msra.mxu2 %v3130_v24 }
  0x6b   :  { %1576 = vmatpush.bf16.msra.mxu3 %v3258_v27  ;;  %v3831_v27 = vld [vmem:[#allocation8 + $0x3a4] sm:$0xf] }
  0x6c   :  { %1589 = vmatpush.bf16.msrb.mxu0 %v2638_v32  ;;  %v3086_v40 = vor.u32 %v3831_v27, %v3083_v28  ;;  %v3783_v27 = vld [vmem:[#allocation8 + $0x224] sm:$0xf]  ;;  %v2891_v28 = vld [vmem:[#allocation8 + $0x230] sm:$0xf0] }
  0x6d   :  { %1603 = vmatpush.bf16.msrb.mxu1 %v2766_v33  ;;  %v3374_v33 = vor.u32 %v3903_v17, %v3371_v21  ;;  %v3035_v17 = vld [vmem:[#allocation8 + $0x350] sm:$0xf0] }
  0x6e   :  { %v3179_v21 = vld [vmem:[#allocation8 + $0x470] sm:$0xf0]  ;;  %v3038_v23 = vor.u32 %v3819_v16, %v3035_v17  ;;  %v3738_v16 = vld [vmem:[#allocation8 + $0xb4] sm:$0xf0]  ;;  %v2833_v17 = vld [vmem:[#allocation8 + $0x1a8] sm:$0xf] }
  0x70   :  { %1590 = vmatpush.bf16.msrb.mxu0 %v2622_v36  ;;  %v3227_v36 = vld [vmem:[#allocation8 + $0x4d0] sm:$0xf0] }
  0x71   :  { %1604 = vmatpush.bf16.msrb.mxu1 %v2750_v39 }
  0xa8   :  { %v244_v41 = vpop.f32.mrf.mxu0 }
  0xa9   :  { %v258_v42 = vpop.f32.mrf.mxu1  ;;  %v245_v45 = vadd.f32 %v244_v41, %v159_v43  ;;  %v3355_v41 = vld [vmem:[#allocation8 + $0x5d0] sm:$0xf0] }
  0xaa   :  { %v259_v47 = vadd.f32 %v258_v42, %v160_v44  ;;  %v3795_v42 = vld [vmem:[#allocation8 + $0x284] sm:$0xf] }
  0xab   :  { %v319_v57 = vmax.f32 %v245_v45, 0.0  ;;  %v3827_v45 = vld [vmem:[#allocation8 + $0x384] sm:$0xf] }
  0xac   :  { %v320_v60 = vmax.f32 %v259_v47, 0.0  ;;  %v3230_v47 = vor.u32 %v3867_v35, %v3227_v36  ;;  %v3163_v35 = vld [vmem:[#allocation8 + $0x450] sm:$0xf0]  ;;  %v3883_v36 = vld [vmem:[#allocation8 + $0x544] sm:$0xf] }
  0xb0   :  { %v272_v46 = vpop.f32.mrf.mxu2  ;;  %v246_v49 = vpop.f32.mrf.mxu0 }
  0xb1   :  { %v286_v48 = vpop.f32.mrf.mxu3  ;;  %v247_v50 = vadd.f32 %v246_v49, %v159_v43  ;;  %v260_v51 = vpop.f32.mrf.mxu1  ;;  %v273_v3 = vadd.f32 %v272_v46, %v161_v53  ;;  %v2939_v43 = vld [vmem:[#allocation8 + $0x290] sm:$0xf0] }
  0xb2   :  { %v261_v54 = vadd.f32 %v260_v51, %v160_v44  ;;  %v287_v7 = vadd.f32 %v286_v48, %v162_v58  ;;  %v3067_v46 = vld [vmem:[#allocation8 + $0x390] sm:$0xf0]  ;;  %v3863_v48 = vld [vmem:[#allocation8 + $0x4a4] sm:$0xf]  ;;  %v2942_v51 = vor.u32 %v3795_v42, %v2939_v43 }
  0xb3   :  { %v325_v59 = vmax.f32 %v247_v50, 0.0  ;;  %v321_v24 = vmax.f32 %v273_v3, 0.0  ;;  %v3358_v50 = vor.u32 %v3899_v37, %v3355_v41  ;;  %v3214_v2 = vor.u32 %v3863_v48, %v3211_v26  ;;  %v3779_v41 = vld [vmem:[#allocation8 + $0x204] sm:$0xf]  ;;  %v2875_v42 = vld [vmem:[#allocation8 + $0x210] sm:$0xf0] }
  0xb4   :  { %v326_v61 = vmax.f32 %v261_v54, 0.0  ;;  %v322_v29 = vmax.f32 %v287_v7, 0.0  ;;  %v3195_v7 = vld [vmem:[#allocation8 + $0x490] sm:$0xf0]  ;;  %v2894_v37 = vor.u32 %v3783_v27, %v2891_v28  ;;  %v3811_v43 = vld [vmem:[#allocation8 + $0x304] sm:$0xf] }
  0xb5   :  { %v4355_v63 = vpack.c.bf16 %v325_v59, %v319_v57  ;;  %v3070_v57 = vor.u32 %v3827_v45, %v3067_v46  ;;  %v2923_v59 = vld [vmem:[#allocation8 + $0x270] sm:$0xf0]  ;;  %v2737_v45 = vld [vmem:[#allocation8 + $0xe8] sm:$0xf]  ;;  %v3838_v28 = vld [vmem:[#allocation8 + $0x3d4] sm:$0xf0] }
  0xb6   :  { %v4357_v4 = vpack.c.bf16 %v326_v61, %v320_v60  ;;  %v2865_v48 = vld [vmem:[#allocation8 + $0x1e8] sm:$0xf]  ;;  %v3147_v26 = vld [vmem:[#allocation8 + $0x430] sm:$0xf0] }
  0xb7   :  { %1507 = vmatmul.bf16.vlgmr.msrb.gmra.mxu2 %v4355_v63  ;;  %v3105_v27 = vld [vmem:[#allocation8 + $0x3c8] sm:$0xf] }
  0xb8   :  { %v274_v8 = vpop.f32.mrf.mxu2  ;;  %1521 = vmatmul.bf16.vlgmr.msrb.gmra.mxu3 %v4357_v4  ;;  %1611 = vmatpush.bf16.msrb.mxu2 %v2990_v62  ;;  %v300_v13 = vpop.f32.mrf.mxu0  ;;  %v3823_v62 = vld [vmem:[#allocation8 + $0x364] sm:$0xf] }
  0xb9   :  { %v275_v10 = vadd.f32 %v274_v8, %v161_v53  ;;  %v288_v11 = vpop.f32.mrf.mxu3  ;;  %1625 = vmatpush.bf16.msrb.mxu3 %v3118_v0  ;;  %v314_v19 = vpop.f32.mrf.mxu1  ;;  %v301_v39 = vadd.f32 %v300_v13, %v163_v12  ;;  %v3339_v53 = vld [vmem:[#allocation8 + $0x5b0] sm:$0xf0]  ;;  %v3787_v13 = vld [vmem:[#allocation8 + $0x244] sm:$0xf] }
  0xba   :  { %v289_v18 = vadd.f32 %v288_v11, %v162_v58  ;;  %v315_v44 = vadd.f32 %v314_v19, %v164_v14  ;;  %v3791_v58 = vld [vmem:[#allocation8 + $0x264] sm:$0xf]  ;;  %v3051_v0 = vld [vmem:[#allocation8 + $0x370] sm:$0xf0]  ;;  %v3342_v5 = vor.u32 %v3895_v52, %v3339_v53  ;;  %v2878_v52 = vor.u32 %v3779_v41, %v2875_v42  ;;  %v3089_v41 = vld [vmem:[#allocation8 + $0x3a8] sm:$0xf] }
  0xbb   :  { %v327_v25 = vmax.f32 %v275_v10, 0.0  ;;  %v323_v54 = vmax.f32 %v301_v39, 0.0  ;;  %v2926_v9 = vor.u32 %v3791_v58, %v2923_v59  ;;  %v3054_v10 = vor.u32 %v3823_v62, %v3051_v0  ;;  %v3891_v11 = vld [vmem:[#allocation8 + $0x584] sm:$0xf]  ;;  %v2721_v58 = vld [vmem:[#allocation8 + $0xc8] sm:$0xf] }
  0xbc   :  { %v328_v30 = vmax.f32 %v289_v18, 0.0  ;;  %1612 = vmatpush.bf16.msrb.mxu2 %v2974_v15  ;;  %v324_v60 = vmax.f32 %v315_v44, 0.0  ;;  %v2907_v15 = vld [vmem:[#allocation8 + $0x250] sm:$0xf0]  ;;  %v3198_v18 = vor.u32 %v3859_v6, %v3195_v7  ;;  %v3774_v62 = vld [vmem:[#allocation8 + $0x1d4] sm:$0xf0] }
  0xbd   :  { %v4363_v32 = vpack.c.bf16 %v327_v25, %v321_v24  ;;  %1626 = vmatpush.bf16.msrb.mxu3 %v3102_v20  ;;  %v3855_v20 = vld [vmem:[#allocation8 + $0x464] sm:$0xf]  ;;  %v2910_v22 = vor.u32 %v3787_v13, %v2907_v15  ;;  %v3307_v25 = vld [vmem:[#allocation8 + $0x570] sm:$0xf0]  ;;  %v2993_v6 = vld [vmem:[#allocation8 + $0x2e8] sm:$0xf] }
  0xbe   :  { %v4365_v38 = vpack.c.bf16 %v328_v30, %v322_v29  ;;  %v3887_v24 = vld [vmem:[#allocation8 + $0x564] sm:$0xf]  ;;  %v3019_v30 = vld [vmem:[#allocation8 + $0x330] sm:$0xf0]  ;;  %v3810_v7 = vld [vmem:[#allocation8 + $0x2f4] sm:$0xf0] }
  0xbf   :  { %1535 = vmatmul.bf16.vlgmr.msra.gmra.mxu0 %v4363_v32  ;;  %v3815_v29 = vld [vmem:[#allocation8 + $0x324] sm:$0xf]  ;;  %v3003_v44 = vld [vmem:[#allocation8 + $0x310] sm:$0xf0]  ;;  %v2705_v13 = vld [vmem:[#allocation8 + $0xa8] sm:$0xf] }
  0xc0   :  { %1549 = vmatmul.bf16.vlgmr.msra.gmra.mxu1 %v4365_v38  ;;  %1639 = vmatpush.bf16.msra.mxu0 %v3246_v31  ;;  %v302_v49 = vpop.f32.mrf.mxu0  ;;  %v3182_v31 = vor.u32 %v3855_v20, %v3179_v21  ;;  %v3022_v39 = vor.u32 %v3815_v29, %v3019_v30  ;;  %v3006_v53 = vor.u32 %v3811_v43, %v3003_v44  ;;  %v2689_v29 = vld [vmem:[#allocation8 + $0x88] sm:$0xf]  ;;  %v3734_v30 = vld [vmem:[#allocation8 + $0x94] sm:$0xf0] }
  0xc1   :  { %1653 = vmatpush.bf16.msra.mxu1 %v3374_v33  ;;  %1613 = vmatpush.bf16.msrb.mxu2 %v2958_v34  ;;  %v303_v55 = vadd.f32 %v302_v49, %v163_v12  ;;  %v316_v56 = vpop.f32.mrf.mxu1  ;;  %v3323_v12 = vld [vmem:[#allocation8 + $0x590] sm:$0xf0]  ;;  %v3310_v33 = vor.u32 %v3887_v24, %v3307_v25  ;;  %v3851_v34 = vld [vmem:[#allocation8 + $0x444] sm:$0xf]  ;;  %v3778_v49 = vld [vmem:[#allocation8 + $0x1f4] sm:$0xf0]  ;;  %v2994_v20 = vor.u32 %v3810_v7, %v2993_v6 }
  0xc2   :  { %1627 = vmatpush.bf16.msrb.mxu3 %v3086_v40  ;;  %v317_v61 = vadd.f32 %v316_v56, %v164_v14  ;;  %v3326_v19 = vor.u32 %v3891_v11, %v3323_v12  ;;  %v3291_v40 = vld [vmem:[#allocation8 + $0x550] sm:$0xf0]  ;;  %v3166_v46 = vor.u32 %v3851_v34, %v3163_v35  ;;  %v3121_v11 = vld [vmem:[#allocation8 + $0x3e8] sm:$0xf]  ;;  %v3842_v12 = vld [vmem:[#allocation8 + $0x3f4] sm:$0xf0]  ;;  %v2706_v24 = vor.u32 %v3738_v16, %v2705_v13 }
  0xc3   :  { %v329_v1 = vmax.f32 %v303_v55, 0.0  ;;  %v3275_v55 = vld [vmem:[#allocation8 + $0x530] sm:$0xf0]  ;;  %v3122_v21 = vor.u32 %v3842_v12, %v3121_v11  ;;  %v3106_v35 = vor.u32 %v3838_v28, %v3105_v27  ;;  %v3834_v42 = vld [vmem:[#allocation8 + $0x3b4] sm:$0xf0] }
  0xc4   :  { %1640 = vmatpush.bf16.msra.mxu0 %v3230_v47  ;;  %v330_v3 = vmax.f32 %v317_v61, 0.0  ;;  %v3746_v47 = vld [vmem:[#allocation8 + $0xf4] sm:$0xf0]  ;;  %v2849_v61 = vld [vmem:[#allocation8 + $0x1c8] sm:$0xf] }
  0xc5   :  { %1654 = vmatpush.bf16.msra.mxu1 %v3358_v50  ;;  %1614 = vmatpush.bf16.msrb.mxu2 %v2942_v51  ;;  %v4369_v8 = vpack.c.bf16 %v329_v1, %v323_v54  ;;  %v3294_v50 = vor.u32 %v3883_v36, %v3291_v40  ;;  %v3847_v51 = vld [vmem:[#allocation8 + $0x424] sm:$0xf]  ;;  %v2738_v56 = vor.u32 %v3746_v47, %v2737_v45  ;;  %v2961_v36 = vld [vmem:[#allocation8 + $0x2a8] sm:$0xf]  ;;  %v3730_v44 = vld [vmem:[#allocation8 + $0x74] sm:$0xf0] }
  0xc6   :  { %1628 = vmatpush.bf16.msrb.mxu3 %v3070_v57  ;;  %v4371_v14 = vpack.c.bf16 %v330_v3, %v324_v60  ;;  %v3879_v54 = vld [vmem:[#allocation8 + $0x524] sm:$0xf]  ;;  %v2866_v57 = vor.u32 %v3778_v49, %v2865_v48  ;;  %v3150_v59 = vor.u32 %v3847_v51, %v3147_v26  ;;  %v3742_v60 = vld [vmem:[#allocation8 + $0xd4] sm:$0xf0]  ;;  %v2673_v43 = vld [vmem:[#allocation8 + $0x68] sm:$0xf]  ;;  %v3090_v48 = vor.u32 %v3834_v42, %v3089_v41 }
  0xc7   :  { %1563 = vmatmul.bf16.vlgmr.msra.gmra.mxu2 %v4369_v8  ;;  %v3278_v0 = vor.u32 %v3879_v54, %v3275_v55  ;;  %v3843_v1 = vld [vmem:[#allocation8 + $0x404] sm:$0xf]  ;;  %v2801_v45 = vld [vmem:[#allocation8 + $0x168] sm:$0xf]  ;;  %v2674_v51 = vor.u32 %v3730_v44, %v2673_v43  ;;  %v3726_v55 = vld [vmem:[#allocation8 + $0x54] sm:$0xf0] }
  0xc8   :  { %1641 = vmatpush.bf16.msra.mxu0 %v3214_v2  ;;  %1577 = vmatmul.bf16.vlgmr.msra.gmra.mxu3 %v4371_v14  ;;  %v3131_v2 = vld [vmem:[#allocation8 + $0x410] sm:$0xf0]  ;;  %v3875_v3 = vld [vmem:[#allocation8 + $0x504] sm:$0xf]  ;;  %v2945_v49 = vld [vmem:[#allocation8 + $0x288] sm:$0xf] }
  0xc9   :  { %1655 = vmatpush.bf16.msra.mxu1 %v3342_v5  ;;  %1615 = vmatpush.bf16.msrb.mxu2 %v2926_v9  ;;  %v3259_v5 = vld [vmem:[#allocation8 + $0x510] sm:$0xf0]  ;;  %v2722_v9 = vor.u32 %v3742_v60, %v2721_v58  ;;  %v3134_v15 = vor.u32 %v3843_v1, %v3131_v2  ;;  %v2657_v54 = vld [vmem:[#allocation8 + $0x48] sm:$0xf]  ;;  %v3826_v2 = vld [vmem:[#allocation8 + $0x374] sm:$0xf0] }
  0xca   :  { %1629 = vmatpush.bf16.msrb.mxu3 %v3054_v10  ;;  %v2850_v10 = vor.u32 %v3774_v62, %v2849_v61  ;;  %v2929_v60 = vld [vmem:[#allocation8 + $0x268] sm:$0xf]  ;;  %v3794_v61 = vld [vmem:[#allocation8 + $0x274] sm:$0xf0]  ;;  %v2658_v62 = vor.u32 %v3726_v55, %v2657_v54 }
  0xcb   :  { %v3057_v1 = vld [vmem:[#allocation8 + $0x368] sm:$0xf]  ;;  %v3754_v7 = vld [vmem:[#allocation8 + $0x134] sm:$0xf0] }
  0xcc   :  { %1642 = vmatpush.bf16.msra.mxu0 %v3198_v18  ;;  %v3770_v18 = vld [vmem:[#allocation8 + $0x1b4] sm:$0xf0]  ;;  %v2769_v6 = vld [vmem:[#allocation8 + $0x128] sm:$0xf] }
  0xcd   :  { %1656 = vmatpush.bf16.msra.mxu1 %v3326_v19  ;;  %1616 = vmatpush.bf16.msrb.mxu2 %v2910_v22  ;;  %v3262_v19 = vor.u32 %v3875_v3, %v3259_v5  ;;  %v2977_v22 = vld [vmem:[#allocation8 + $0x2c8] sm:$0xf]  ;;  %v2834_v25 = vor.u32 %v3770_v18, %v2833_v17  ;;  %v3722_v5 = vld [vmem:[#allocation8 + $0x34] sm:$0xf0]  ;;  %v2770_v16 = vor.u32 %v3754_v7, %v2769_v6 }
  0xce   :  { %1630 = vmatpush.bf16.msrb.mxu3 %v3038_v23  ;;  %v3806_v23 = vld [vmem:[#allocation8 + $0x2d4] sm:$0xf0]  ;;  %v2641_v3 = vld [vmem:[#allocation8 + $0x28] sm:$0xf] }
  0xcf   :  { %1591 = vmatmul.bf16.vlgmr.msrb.gmra.mxu0 %v4355_v63  ;;  %v2978_v34 = vor.u32 %v3806_v23, %v2977_v22  ;;  %v2913_v11 = vld [vmem:[#allocation8 + $0x248] sm:$0xf]  ;;  %v3790_v12 = vld [vmem:[#allocation8 + $0x254] sm:$0xf0] }
  0xd0   :  { %1605 = vmatmul.bf16.vlgmr.msrb.gmra.mxu1 %v4357_v4  ;;  %1643 = vmatpush.bf16.msra.mxu0 %v3182_v31  ;;  %v2817_v31 = vld [vmem:[#allocation8 + $0x188] sm:$0xf]  ;;  %v3822_v17 = vld [vmem:[#allocation8 + $0x354] sm:$0xf0]  ;;  %v2914_v23 = vor.u32 %v3790_v12, %v2913_v11 }
  0xd1   :  { %1657 = vmatpush.bf16.msra.mxu1 %v3310_v33  ;;  %1617 = vmatpush.bf16.msrb.mxu2 %v2894_v37  ;;  %v3766_v33 = vld [vmem:[#allocation8 + $0x194] sm:$0xf0]  ;;  %v3041_v13 = vld [vmem:[#allocation8 + $0x348] sm:$0xf] }
  0xd2   :  { %1631 = vmatpush.bf16.msrb.mxu3 %v3022_v39  ;;  %v3802_v37 = vld [vmem:[#allocation8 + $0x2b4] sm:$0xf0]  ;;  %v2690_v39 = vor.u32 %v3734_v30, %v2689_v29  ;;  %v2818_v40 = vor.u32 %v3766_v33, %v2817_v31  ;;  %v2625_v18 = vld [vmem:[#allocation8 + $0x8] sm:$0xf]  ;;  %v3042_v28 = vor.u32 %v3822_v17, %v3041_v13  ;;  %v3736_v13 = vld [vmem:[#allocation8 + $0xac] sm:$0xf] }
  0xd3   :  { %v2962_v47 = vor.u32 %v3802_v37, %v2961_v36  ;;  %v3249_v22 = vld [vmem:[#allocation8 + $0x4e8] sm:$0xf]  ;;  %v3906_v27 = vld [vmem:[#allocation8 + $0x5f4] sm:$0xf0]  ;;  %v3768_v17 = vld [vmem:[#allocation8 + $0x1ac] sm:$0xf] }
  0xd4   :  { %1644 = vmatpush.bf16.msra.mxu0 %v3166_v46  ;;  %v3762_v46 = vld [vmem:[#allocation8 + $0x174] sm:$0xf0]  ;;  %v2897_v29 = vld [vmem:[#allocation8 + $0x228] sm:$0xf] }
  0xd5   :  { %1658 = vmatpush.bf16.msra.mxu1 %v3294_v50  ;;  %1618 = vmatpush.bf16.msrb.mxu2 %v2878_v52  ;;  %v3798_v50 = vld [vmem:[#allocation8 + $0x294] sm:$0xf0]  ;;  %v2802_v26 = vor.u32 %v3762_v46, %v2801_v45  ;;  %v3073_v52 = vld [vmem:[#allocation8 + $0x388] sm:$0xf] }
  0xd6   :  { %1632 = vmatpush.bf16.msrb.mxu3 %v3006_v53  ;;  %v3830_v53 = vld [vmem:[#allocation8 + $0x394] sm:$0xf0]  ;;  %v2946_v58 = vor.u32 %v3798_v50, %v2945_v49  ;;  %v3361_v42 = vld [vmem:[#allocation8 + $0x5c8] sm:$0xf]  ;;  %v3744_v49 = vld [vmem:[#allocation8 + $0xec] sm:$0xf] }
  0xd7   :  { %v3786_v30 = vld [vmem:[#allocation8 + $0x234] sm:$0xf0]  ;;  %v2881_v45 = vld [vmem:[#allocation8 + $0x208] sm:$0xf]  ;;  %v2739_v50 = vld [vmem:[#allocation8 + $0xf8] sm:$0xf0] }
  0xd8   :  { %1645 = vmatpush.bf16.msra.mxu0 %v3150_v59  ;;  %1619 = vmatmul.bf16.vlgmr.msrb.gmra.mxu2 %v4363_v32  ;;  %v3074_v59 = vor.u32 %v3830_v53, %v3073_v52  ;;  %v3870_v41 = vld [vmem:[#allocation8 + $0x4d4] sm:$0xf0]  ;;  %v3776_v52 = vld [vmem:[#allocation8 + $0x1ec] sm:$0xf]  ;;  %v2867_v53 = vld [vmem:[#allocation8 + $0x1f8] sm:$0xf0] }
  0xd9   :  { %1667 = vmatpush.bf16.msra.mxu2 %v2738_v56  ;;  %1659 = vmatpush.bf16.msra.mxu1 %v3278_v0  ;;  %v2785_v56 = vld [vmem:[#allocation8 + $0x148] sm:$0xf]  ;;  %v3902_v43 = vld [vmem:[#allocation8 + $0x5d4] sm:$0xf0] }
  0xda   :  { %1681 = vmatpush.bf16.msra.mxu3 %v2866_v57  ;;  %v3758_v57 = vld [vmem:[#allocation8 + $0x154] sm:$0xf0]  ;;  %v3217_v55 = vld [vmem:[#allocation8 + $0x4a8] sm:$0xf] }
  0xdb   :  { %1633 = vmatmul.bf16.vlgmr.msrb.gmra.mxu3 %v4365_v38  ;;  %v2786_v0 = vor.u32 %v3758_v57, %v2785_v56  ;;  %v3782_v46 = vld [vmem:[#allocation8 + $0x214] sm:$0xf0]  ;;  %v3201_v6 = vld [vmem:[#allocation8 + $0x488] sm:$0xf] }
  0xdc   :  { %1646 = vmatpush.bf16.msra.mxu0 %v3134_v15  ;;  %v2642_v15 = vor.u32 %v3722_v5, %v2641_v3  ;;  %v2882_v54 = vor.u32 %v3782_v46, %v2881_v45  ;;  %v3866_v56 = vld [vmem:[#allocation8 + $0x4b4] sm:$0xf0]  ;;  %v2851_v3 = vld [vmem:[#allocation8 + $0x1d8] sm:$0xf0] }
  0xdd   :  { %1668 = vmatpush.bf16.msra.mxu2 %v2722_v9  ;;  %1660 = vmatpush.bf16.msra.mxu1 %v3262_v19  ;;  %v2930_v9 = vor.u32 %v3794_v61, %v2929_v60  ;;  %v3718_v19 = vld [vmem:[#allocation8 + $0x14] sm:$0xf0]  ;;  %v2870_v61 = vor.u32 %v3776_v52, %v2867_v53  ;;  %v2803_v45 = vld [vmem:[#allocation8 + $0x178] sm:$0xf0]  ;;  %v3724_v52 = vld [vmem:[#allocation8 + $0x4c] sm:$0xf] }
  0xde   :  { %1682 = vmatpush.bf16.msra.mxu3 %v2850_v10  ;;  %v3058_v10 = vor.u32 %v3826_v2, %v3057_v1  ;;  %v2626_v31 = vor.u32 %v3718_v19, %v2625_v18  ;;  %v3898_v60 = vld [vmem:[#allocation8 + $0x5b4] sm:$0xf0]  ;;  %v3218_v1 = vor.u32 %v3866_v56, %v3217_v55  ;;  %v3772_v2 = vld [vmem:[#allocation8 + $0x1cc] sm:$0xf]  ;;  %v2835_v18 = vld [vmem:[#allocation8 + $0x1b8] sm:$0xf0] }
  0xdf   :  { %1647 = vmatmul.bf16.vlgmr.msra.gmra.mxu0 %v4369_v8  ;;  %v3862_v7 = vld [vmem:[#allocation8 + $0x494] sm:$0xf0]  ;;  %v2854_v12 = vor.u32 %v3772_v2, %v2851_v3  ;;  %v2659_v53 = vld [vmem:[#allocation8 + $0x58] sm:$0xf0]  ;;  %v3756_v55 = vld [vmem:[#allocation8 + $0x14c] sm:$0xf] }
  0xe0   :  { %1695 = vmatpush.bf16.msrb.mxu0 %v2994_v20  ;;  %1661 = vmatmul.bf16.vlgmr.msra.gmra.mxu1 %v4371_v14  ;;  %v2753_v20 = vld [vmem:[#allocation8 + $0x108] sm:$0xf]  ;;  %v3894_v11 = vld [vmem:[#allocation8 + $0x594] sm:$0xf0]  ;;  %v2787_v56 = vld [vmem:[#allocation8 + $0x158] sm:$0xf0] }
  0xe1   :  { %1709 = vmatpush.bf16.msrb.mxu1 %v3122_v21  ;;  %1669 = vmatpush.bf16.msra.mxu2 %v2706_v24  ;;  %v3750_v21 = vld [vmem:[#allocation8 + $0x114] sm:$0xf0]  ;;  %v3840_v2 = vld [vmem:[#allocation8 + $0x3ec] sm:$0xf]  ;;  %v2790_v3 = vor.u32 %v3756_v55, %v2787_v56  ;;  %v3219_v55 = vld [vmem:[#allocation8 + $0x4b8] sm:$0xf0] }
  0xe2   :  { %1683 = vmatpush.bf16.msra.mxu3 %v2834_v25  ;;  %v3874_v24 = vld [vmem:[#allocation8 + $0x4f4] sm:$0xf0]  ;;  %v3377_v25 = vld [vmem:[#allocation8 + $0x5e8] sm:$0xf]  ;;  %v2754_v33 = vor.u32 %v3750_v21, %v2753_v20 }
  0xe3   :  { %v3250_v36 = vor.u32 %v3874_v24, %v3249_v22  ;;  %v3378_v37 = vor.u32 %v3906_v27, %v3377_v25  ;;  %v3185_v20 = vld [vmem:[#allocation8 + $0x468] sm:$0xf]  ;;  %v3858_v21 = vld [vmem:[#allocation8 + $0x474] sm:$0xf0]  ;;  %v2838_v25 = vor.u32 %v3768_v17, %v2835_v18  ;;  %v3732_v27 = vld [vmem:[#allocation8 + $0x8c] sm:$0xf] }
  0xe4   :  { %1696 = vmatpush.bf16.msrb.mxu0 %v2978_v34  ;;  %v3025_v34 = vld [vmem:[#allocation8 + $0x328] sm:$0xf]  ;;  %v3890_v24 = vld [vmem:[#allocation8 + $0x574] sm:$0xf0]  ;;  %v2979_v18 = vld [vmem:[#allocation8 + $0x2d8] sm:$0xf0] }
  0xe5   :  { %1710 = vmatpush.bf16.msrb.mxu1 %v3106_v35  ;;  %1670 = vmatpush.bf16.msra.mxu2 %v2690_v39  ;;  %v3818_v35 = vld [vmem:[#allocation8 + $0x334] sm:$0xf0]  ;;  %v3233_v39 = vld [vmem:[#allocation8 + $0x4c8] sm:$0xf] }
  0xe6   :  { %1684 = vmatpush.bf16.msra.mxu3 %v2818_v40  ;;  %v2898_v40 = vor.u32 %v3786_v30, %v2897_v29  ;;  %v3026_v44 = vor.u32 %v3818_v35, %v3025_v34  ;;  %v3186_v29 = vor.u32 %v3858_v21, %v3185_v20  ;;  %v3764_v30 = vld [vmem:[#allocation8 + $0x18c] sm:$0xf]  ;;  %v3169_v34 = vld [vmem:[#allocation8 + $0x448] sm:$0xf]  ;;  %v3854_v35 = vld [vmem:[#allocation8 + $0x454] sm:$0xf0] }
  0xe7   :  { %v3107_v20 = vld [vmem:[#allocation8 + $0x3d8] sm:$0xf0] }
  0xe8   :  { %1697 = vmatpush.bf16.msrb.mxu0 %v2962_v47  ;;  %v3009_v47 = vld [vmem:[#allocation8 + $0x308] sm:$0xf] }
  0xe9   :  { %1711 = vmatpush.bf16.msrb.mxu1 %v3090_v48  ;;  %1671 = vmatpush.bf16.msra.mxu2 %v2674_v51  ;;  %v3814_v48 = vld [vmem:[#allocation8 + $0x314] sm:$0xf0]  ;;  %v3234_v51 = vor.u32 %v3870_v41, %v3233_v39  ;;  %v3728_v41 = vld [vmem:[#allocation8 + $0x6c] sm:$0xf] }
  0xea   :  { %1685 = vmatpush.bf16.msra.mxu3 %v2802_v26  ;;  %v3362_v26 = vor.u32 %v3902_v43, %v3361_v42  ;;  %v3010_v57 = vor.u32 %v3814_v48, %v3009_v47  ;;  %v3886_v39 = vld [vmem:[#allocation8 + $0x554] sm:$0xf0]  ;;  %v2675_v42 = vld [vmem:[#allocation8 + $0x78] sm:$0xf0]  ;;  %v3170_v43 = vor.u32 %v3854_v35, %v3169_v34  ;;  %v3153_v47 = vld [vmem:[#allocation8 + $0x428] sm:$0xf] }
  0xeb   :  { %v3850_v48 = vld [vmem:[#allocation8 + $0x434] sm:$0xf0]  ;;  %v3800_v35 = vld [vmem:[#allocation8 + $0x2ac] sm:$0xf] }
  0xec   :  { %1698 = vmatpush.bf16.msrb.mxu0 %v2946_v58  ;;  %v2742_v58 = vor.u32 %v3744_v49, %v2739_v50  ;;  %v2678_v49 = vor.u32 %v3728_v41, %v2675_v42  ;;  %v3281_v50 = vld [vmem:[#allocation8 + $0x528] sm:$0xf]  ;;  %v3091_v41 = vld [vmem:[#allocation8 + $0x3b8] sm:$0xf0] }
  0xed   :  { %1712 = vmatpush.bf16.msrb.mxu1 %v3074_v59  ;;  %1672 = vmatpush.bf16.msra.mxu2 %v2658_v62  ;;  %v3345_v59 = vld [vmem:[#allocation8 + $0x5a8] sm:$0xf]  ;;  %v3740_v62 = vld [vmem:[#allocation8 + $0xcc] sm:$0xf] }
  0xee   :  { %1686 = vmatpush.bf16.msra.mxu3 %v2786_v0  ;;  %v2723_v0 = vld [vmem:[#allocation8 + $0xd8] sm:$0xf0]  ;;  %v3346_v5 = vor.u32 %v3898_v60, %v3345_v59  ;;  %v3846_v59 = vld [vmem:[#allocation8 + $0x414] sm:$0xf0]  ;;  %v3265_v60 = vld [vmem:[#allocation8 + $0x508] sm:$0xf] }
  0xf0   :  { %1699 = vmatpush.bf16.msrb.mxu0 %v2930_v9  ;;  %v2726_v9 = vor.u32 %v3740_v62, %v2723_v0  ;;  %v2662_v62 = vor.u32 %v3724_v52, %v2659_v53  ;;  %v3808_v0 = vld [vmem:[#allocation8 + $0x2ec] sm:$0xf]  ;;  %v3075_v52 = vld [vmem:[#allocation8 + $0x398] sm:$0xf0] }
  0xf1   :  { %1713 = vmatpush.bf16.msrb.mxu1 %v3058_v10  ;;  %1673 = vmatpush.bf16.msra.mxu2 %v2642_v15  ;;  %v3329_v10 = vld [vmem:[#allocation8 + $0x588] sm:$0xf]  ;;  %v2707_v15 = vld [vmem:[#allocation8 + $0xb8] sm:$0xf0] }
  0xf2   :  { %1687 = vmatpush.bf16.msra.mxu3 %v2770_v16  ;;  %v3202_v16 = vor.u32 %v3862_v7, %v3201_v6  ;;  %v3330_v19 = vor.u32 %v3894_v11, %v3329_v10  ;;  %v2710_v22 = vor.u32 %v3736_v13, %v2707_v15  ;;  %v3720_v6 = vld [vmem:[#allocation8 + $0x2c] sm:$0xf]  ;;  %v2643_v7 = vld [vmem:[#allocation8 + $0x38] sm:$0xf0] }
  0xf3   :  { %v3752_v10 = vld [vmem:[#allocation8 + $0x12c] sm:$0xf]  ;;  %v2771_v11 = vld [vmem:[#allocation8 + $0x138] sm:$0xf0]  ;;  %v2646_v17 = vor.u32 %v3720_v6, %v2643_v7 }
  0xf4   :  { %1700 = vmatpush.bf16.msrb.mxu0 %v2914_v23  ;;  %v3313_v23 = vld [vmem:[#allocation8 + $0x568] sm:$0xf]  ;;  %v3804_v15 = vld [vmem:[#allocation8 + $0x2cc] sm:$0xf]  ;;  %v2774_v21 = vor.u32 %v3752_v10, %v2771_v11  ;;  %v3331_v7 = vld [vmem:[#allocation8 + $0x598] sm:$0xf0] }
  0xf5   :  { %1714 = vmatpush.bf16.msrb.mxu1 %v3042_v28  ;;  %1674 = vmatpush.bf16.msra.mxu2 %v2626_v31  ;;  %v2691_v28 = vld [vmem:[#allocation8 + $0x98] sm:$0xf0]  ;;  %v3892_v6 = vld [vmem:[#allocation8 + $0x58c] sm:$0xf] }
  0xf6   :  { %1688 = vmatpush.bf16.msra.mxu3 %v2754_v33  ;;  %v2819_v31 = vld [vmem:[#allocation8 + $0x198] sm:$0xf0]  ;;  %v3314_v33 = vor.u32 %v3890_v24, %v3313_v23  ;;  %v3748_v24 = vld [vmem:[#allocation8 + $0x10c] sm:$0xf] }
  0xf7   :  { %v2627_v23 = vld [vmem:[#allocation8 + $0x18] sm:$0xf0]  ;;  %v3788_v10 = vld [vmem:[#allocation8 + $0x24c] sm:$0xf] }
  0xf8   :  { %1701 = vmatpush.bf16.msrb.mxu0 %v2898_v40  ;;  %1675 = vmatmul.bf16.vlgmr.msra.gmra.mxu2 %v4355_v63  ;;  %v2822_v40 = vor.u32 %v3764_v30, %v2819_v31  ;;  %v3904_v30 = vld [vmem:[#allocation8 + $0x5ec] sm:$0xf]  ;;  %v3379_v31 = vld [vmem:[#allocation8 + $0x5f8] sm:$0xf0] }
  0xf9   :  { %1723 = vmatpush.bf16.msrb.mxu2 %v3250_v36  ;;  %1715 = vmatpush.bf16.msrb.mxu1 %v3026_v44  ;;  %v2694_v36 = vor.u32 %v3732_v27, %v2691_v28  ;;  %v3760_v44 = vld [vmem:[#allocation8 + $0x16c] sm:$0xf]  ;;  %v3251_v28 = vld [vmem:[#allocation8 + $0x4f8] sm:$0xf0]  ;;  %v3382_v42 = vor.u32 %v3904_v30, %v3379_v31 }
  0xfa   :  { %1737 = vmatpush.bf16.msrb.mxu3 %v3378_v37  ;;  %v3297_v37 = vld [vmem:[#allocation8 + $0x548] sm:$0xf]  ;;  %v3872_v27 = vld [vmem:[#allocation8 + $0x4ec] sm:$0xf]  ;;  %v3171_v30 = vld [vmem:[#allocation8 + $0x458] sm:$0xf0] }
  0xfb   :  { %1689 = vmatmul.bf16.vlgmr.msra.gmra.mxu3 %v4357_v4  ;;  %v3298_v46 = vor.u32 %v3886_v39, %v3297_v37  ;;  %v3254_v39 = vor.u32 %v3872_v27, %v3251_v28  ;;  %v3027_v27 = vld [vmem:[#allocation8 + $0x338] sm:$0xf0] }
  0xfc   :  { %1702 = vmatpush.bf16.msrb.mxu0 %v2882_v54  ;;  %v3154_v54 = vor.u32 %v3850_v48, %v3153_v47  ;;  %v3363_v47 = vld [vmem:[#allocation8 + $0x5d8] sm:$0xf0] }
  0xfd   :  { %1724 = vmatpush.bf16.msrb.mxu2 %v3234_v51  ;;  %1716 = vmatpush.bf16.msrb.mxu1 %v3010_v57  ;;  %v3882_v51 = vld [vmem:[#allocation8 + $0x534] sm:$0xf0]  ;;  %v3137_v57 = vld [vmem:[#allocation8 + $0x408] sm:$0xf] }
  0xfe   :  { %1738 = vmatpush.bf16.msrb.mxu3 %v3362_v26  ;;  %v2806_v26 = vor.u32 %v3760_v44, %v2803_v45  ;;  %v3235_v44 = vld [vmem:[#allocation8 + $0x4d8] sm:$0xf0] }
  0xff   :  { %1703 = vmatmul.bf16.vlgmr.msrb.gmra.mxu0 %v4363_v32 }
 0x100   :  { %1751 = vmatpush.bf16.msra.mxu0 %v2742_v58  ;;  %1717 = vmatmul.bf16.vlgmr.msrb.gmra.mxu1 %v4365_v38  ;;  %v3282_v58 = vor.u32 %v3882_v51, %v3281_v50  ;;  %v2947_v50 = vld [vmem:[#allocation8 + $0x298] sm:$0xf0] }
 0x101   :  { %1765 = vmatpush.bf16.msra.mxu1 %v2870_v61  ;;  %1725 = vmatpush.bf16.msrb.mxu2 %v3218_v1  ;;  %v3878_v61 = vld [vmem:[#allocation8 + $0x514] sm:$0xf0]  ;;  %v2995_v1 = vld [vmem:[#allocation8 + $0x2f8] sm:$0xf0] }
 0x102   :  { %1739 = vmatpush.bf16.msrb.mxu3 %v3346_v5  ;;  %v3123_v5 = vld [vmem:[#allocation8 + $0x3f8] sm:$0xf0]  ;;  %v2998_v13 = vor.u32 %v3808_v0, %v2995_v1  ;;  %v3824_v0 = vld [vmem:[#allocation8 + $0x36c] sm:$0xf] }
 0x103   :  { %v3059_v1 = vld [vmem:[#allocation8 + $0x378] sm:$0xf0] }
 0x104   :  { %1752 = vmatpush.bf16.msra.mxu0 %v2726_v9  ;;  %v3138_v9 = vor.u32 %v3846_v59, %v3137_v57  ;;  %v3896_v57 = vld [vmem:[#allocation8 + $0x5ac] sm:$0xf] }
 0x105   :  { %1766 = vmatpush.bf16.msra.mxu1 %v2854_v12  ;;  %1726 = vmatpush.bf16.msrb.mxu2 %v3202_v16  ;;  %v3266_v12 = vor.u32 %v3878_v61, %v3265_v60  ;;  %v3126_v16 = vor.u32 %v3840_v2, %v3123_v5  ;;  %v3792_v60 = vld [vmem:[#allocation8 + $0x26c] sm:$0xf]  ;;  %v2931_v61 = vld [vmem:[#allocation8 + $0x278] sm:$0xf0] }
 0x106   :  { %1740 = vmatpush.bf16.msrb.mxu3 %v3330_v19  ;;  %v3836_v19 = vld [vmem:[#allocation8 + $0x3cc] sm:$0xf]  ;;  %v3203_v5 = vld [vmem:[#allocation8 + $0x498] sm:$0xf0] }
 0x108   :  { %1753 = vmatpush.bf16.msra.mxu0 %v2710_v22  ;;  %v3716_v22 = vld [vmem:[#allocation8 + $0xc] sm:$0xf] }
 0x109   :  { %1767 = vmatpush.bf16.msra.mxu1 %v2838_v25  ;;  %1727 = vmatpush.bf16.msrb.mxu2 %v3186_v29  ;;  %v2755_v25 = vld [vmem:[#allocation8 + $0x118] sm:$0xf0]  ;;  %v2982_v29 = vor.u32 %v3804_v15, %v2979_v18  ;;  %v2630_v34 = vor.u32 %v3716_v22, %v2627_v23  ;;  %v3334_v15 = vor.u32 %v3892_v6, %v3331_v7  ;;  %v3784_v22 = vld [vmem:[#allocation8 + $0x22c] sm:$0xf]  ;;  %v3489_v7 = vld [vmem:[#allocation11 + $0xd0] sm:$0xf] }
 0x10a   :  { %1741 = vmatpush.bf16.msrb.mxu3 %v3314_v33  ;;  %v3110_v33 = vor.u32 %v3836_v19, %v3107_v20  ;;  %v2758_v37 = vor.u32 %v3748_v24, %v2755_v25  ;;  %v3888_v19 = vld [vmem:[#allocation8 + $0x56c] sm:$0xf]  ;;  %v3315_v20 = vld [vmem:[#allocation8 + $0x578] sm:$0xf0] }
 0x10b   :  { %v2899_v23 = vld [vmem:[#allocation8 + $0x238] sm:$0xf0]  ;;  %v3816_v25 = vld [vmem:[#allocation8 + $0x32c] sm:$0xf]  ;;  %v3318_v28 = vor.u32 %v3888_v19, %v3315_v20 }
 0x10c   :  { %1754 = vmatpush.bf16.msra.mxu0 %v2694_v36  ;;  %v2963_v36 = vld [vmem:[#allocation8 + $0x2b8] sm:$0xf0]  ;;  %v2902_v31 = vor.u32 %v3784_v22, %v2899_v23  ;;  %v3401_v23 = vld [vmem:[#allocation11 + $0x20] sm:$0xf] }
 0x10d   :  { %1768 = vmatpush.bf16.msra.mxu1 %v2822_v40  ;;  %1728 = vmatpush.bf16.msrb.mxu2 %v3170_v43  ;;  %v3832_v40 = vld [vmem:[#allocation8 + $0x3ac] sm:$0xf]  ;;  %v2966_v45 = vor.u32 %v3800_v35, %v2963_v36  ;;  %v3030_v36 = vor.u32 %v3816_v25, %v3027_v27  ;;  %v3930_v19 = vld [vmem:[#allocation11 + $0xb4] sm:$0xf0] }
 0x10e   :  { %1742 = vmatpush.bf16.msrb.mxu3 %v3298_v46  ;;  %v3868_v43 = vld [vmem:[#allocation8 + $0x4cc] sm:$0xf]  ;;  %v3094_v48 = vor.u32 %v3832_v40, %v3091_v41  ;;  %v3011_v40 = vld [vmem:[#allocation8 + $0x318] sm:$0xf0] }
 0x10f   :  { %v3900_v46 = vld [vmem:[#allocation8 + $0x5cc] sm:$0xf]  ;;  %v3238_v51 = vor.u32 %v3868_v43, %v3235_v44  ;;  %v3441_v43 = vld [vmem:[#allocation11 + $0x70] sm:$0xf]  ;;  %v3922_v44 = vld [vmem:[#allocation11 + $0x74] sm:$0xf0] }
 0x110   :  { %1755 = vmatpush.bf16.msra.mxu0 %v2678_v49  ;;  %v3796_v49 = vld [vmem:[#allocation8 + $0x28c] sm:$0xf]  ;;  %v3366_v53 = vor.u32 %v3900_v46, %v3363_v47  ;;  %v3155_v46 = vld [vmem:[#allocation8 + $0x438] sm:$0xf0]  ;;  %v3505_v47 = vld [vmem:[#allocation11 + $0xf0] sm:$0xf] }
 0x111   :  { %1769 = vmatpush.bf16.msra.mxu1 %v2806_v26  ;;  %1729 = vmatpush.bf16.msrb.mxu2 %v3154_v54  ;;  %v3828_v26 = vld [vmem:[#allocation8 + $0x38c] sm:$0xf]  ;;  %v2950_v56 = vor.u32 %v3796_v49, %v2947_v50 }
 0x112   :  { %1743 = vmatpush.bf16.msrb.mxu3 %v3282_v58  ;;  %v3864_v54 = vld [vmem:[#allocation8 + $0x4ac] sm:$0xf]  ;;  %v3347_v58 = vld [vmem:[#allocation8 + $0x5b8] sm:$0xf0]  ;;  %v3078_v59 = vor.u32 %v3828_v26, %v3075_v52  ;;  %v3442_v52 = vor.u32 %v3922_v44, %v3441_v43  ;;  %v3921_v44 = vld [vmem:[#allocation11 + $0x74] sm:$0xf] }
 0x113   :  { %v3350_v2 = vor.u32 %v3896_v57, %v3347_v58  ;;  %v3780_v35 = vld [vmem:[#allocation8 + $0x20c] sm:$0xf] }
 0x114   :  { %1756 = vmatpush.bf16.msra.mxu0 %v2662_v62  ;;  %v3222_v62 = vor.u32 %v3864_v54, %v3219_v55  ;;  %v3880_v50 = vld [vmem:[#allocation8 + $0x52c] sm:$0xf]  ;;  %v3433_v55 = vld [vmem:[#allocation11 + $0x60] sm:$0xf] }
 0x115   :  { %1770 = vmatpush.bf16.msra.mxu1 %v2790_v3  ;;  %1730 = vmatpush.bf16.msrb.mxu2 %v3138_v9  ;;  %v3860_v3 = vld [vmem:[#allocation8 + $0x48c] sm:$0xf]  ;;  %v3062_v9 = vor.u32 %v3824_v0, %v3059_v1  ;;  %v3267_v0 = vld [vmem:[#allocation8 + $0x518] sm:$0xf0] }
 0x116   :  { %1744 = vmatpush.bf16.msrb.mxu3 %v3266_v12  ;;  %v3206_v11 = vor.u32 %v3860_v3, %v3203_v5  ;;  %v3820_v12 = vld [vmem:[#allocation8 + $0x34c] sm:$0xf]  ;;  %v3425_v3 = vld [vmem:[#allocation11 + $0x50] sm:$0xf]  ;;  %v3918_v5 = vld [vmem:[#allocation11 + $0x54] sm:$0xf0] }
 0x117   :  { %v3844_v54 = vld [vmem:[#allocation8 + $0x40c] sm:$0xf] }
 0x118   :  { %1757 = vmatpush.bf16.msra.mxu0 %v2646_v17  ;;  %1731 = vmatmul.bf16.vlgmr.msrb.gmra.mxu2 %v4369_v8  ;;  %v3187_v17 = vld [vmem:[#allocation8 + $0x478] sm:$0xf0]  ;;  %v3908_v43 = vld [vmem:[#allocation11 + $0x4] sm:$0xf0] }
 0x119   :  { %1779 = vmatpush.bf16.msra.mxu2 %v2998_v13  ;;  %1771 = vmatpush.bf16.msra.mxu1 %v2774_v21  ;;  %v3043_v13 = vld [vmem:[#allocation8 + $0x358] sm:$0xf0] }
 0x11a   :  { %1793 = vmatpush.bf16.msra.mxu3 %v3126_v16  ;;  %v3856_v16 = vld [vmem:[#allocation8 + $0x46c] sm:$0xf]  ;;  %v3046_v21 = vor.u32 %v3820_v12, %v3043_v13  ;;  %v3481_v13 = vld [vmem:[#allocation11 + $0xc0] sm:$0xf] }
 0x11b   :  { %1745 = vmatmul.bf16.vlgmr.msrb.gmra.mxu3 %v4371_v14  ;;  %v3190_v24 = vor.u32 %v3856_v16, %v3187_v17  ;;  %v3914_v17 = vld [vmem:[#allocation11 + $0x34] sm:$0xf0] }
 0x11c   :  { %1758 = vmatpush.bf16.msra.mxu0 %v2630_v34  ;;  %v3299_v34 = vld [vmem:[#allocation8 + $0x558] sm:$0xf0] }
 0x11d   :  { %1780 = vmatpush.bf16.msra.mxu2 %v2982_v29  ;;  %1772 = vmatpush.bf16.msra.mxu1 %v2758_v37  ;;  %v3852_v29 = vld [vmem:[#allocation8 + $0x44c] sm:$0xf]  ;;  %v2883_v37 = vld [vmem:[#allocation8 + $0x218] sm:$0xf0] }
 0x11e   :  { %1794 = vmatpush.bf16.msra.mxu3 %v3110_v33  ;;  %v3884_v33 = vld [vmem:[#allocation8 + $0x54c] sm:$0xf]  ;;  %v3174_v41 = vor.u32 %v3852_v29, %v3171_v30  ;;  %v2886_v49 = vor.u32 %v3780_v35, %v2883_v37  ;;  %v3926_v37 = vld [vmem:[#allocation11 + $0x94] sm:$0xf0] }
 0x11f   :  { %1759 = vmatmul.bf16.vlgmr.msra.gmra.mxu0 %v4355_v63  ;;  %v2934_v63 = vor.u32 %v3792_v60, %v2931_v61  ;;  %v3497_v60 = vld [vmem:[#allocation11 + $0xe0] sm:$0xf]  ;;  %v3936_v61 = vld [vmem:[#allocation11 + $0xe4] sm:$0xf0] }
 0x120   :  { %1807 = vmatpush.bf16.msrb.mxu0 %v3254_v39  ;;  %1773 = vmatmul.bf16.vlgmr.msra.gmra.mxu1 %v4357_v4  ;;  %v2915_v4 = vld [vmem:[#allocation8 + $0x258] sm:$0xf0]  ;;  %v3812_v39 = vld [vmem:[#allocation8 + $0x30c] sm:$0xf] }
 0x121   :  { %1821 = vmatpush.bf16.msrb.mxu1 %v3382_v42  ;;  %1781 = vmatpush.bf16.msra.mxu2 %v2966_v45  ;;  %v2918_v18 = vor.u32 %v3788_v10, %v2915_v4  ;;  %v3848_v42 = vld [vmem:[#allocation8 + $0x42c] sm:$0xf]  ;;  %v3302_v45 = vor.u32 %v3884_v33, %v3299_v34  ;;  %v3014_v26 = vor.u32 %v3812_v39, %v3011_v40  ;;  %v3417_v4 = vld [vmem:[#allocation11 + $0x40] sm:$0xf]  ;;  %v3393_v33 = vld [vmem:[#allocation11 + $0x10] sm:$0xf] }
 0x122   :  { %1795 = vmatpush.bf16.msra.mxu3 %v3094_v48  ;;  %v3938_v48 = vld [vmem:[#allocation11 + $0xf4] sm:$0xf0]  ;;  %v3426_v10 = vor.u32 %v3918_v5, %v3425_v3  ;;  %v3928_v29 = vld [vmem:[#allocation11 + $0xa4] sm:$0xf0] }
 0x123   :  { %v3506_v57 = vor.u32 %v3938_v48, %v3505_v47  ;;  %v3910_v34 = vld [vmem:[#allocation11 + $0x14] sm:$0xf0]  ;;  %v3443_v48 = vld [vmem:[#allocation11 + $0x78] sm:$0xf0] }
 0x124   :  { %1808 = vmatpush.bf16.msrb.mxu0 %v3238_v51  ;;  %v3283_v51 = vld [vmem:[#allocation8 + $0x538] sm:$0xf0]  ;;  %v3394_v40 = vor.u32 %v3910_v34, %v3393_v33  ;;  %v3475_v33 = vld [vmem:[#allocation11 + $0xb8] sm:$0xf0] }
 0x125   :  { %1822 = vmatpush.bf16.msrb.mxu1 %v3366_v53  ;;  %1782 = vmatpush.bf16.msra.mxu2 %v2950_v56  ;;  %v3158_v53 = vor.u32 %v3848_v42, %v3155_v46  ;;  %v3920_v56 = vld [vmem:[#allocation11 + $0x64] sm:$0xf0]  ;;  %v3286_v58 = vor.u32 %v3880_v50, %v3283_v51  ;;  %v3385_v42 = vld [vmem:[#allocation11] sm:$0xf] }
 0x126   :  { %1796 = vmatpush.bf16.msra.mxu3 %v3078_v59  ;;  %v3139_v59 = vld [vmem:[#allocation8 + $0x418] sm:$0xf0]  ;;  %v3434_v1 = vor.u32 %v3920_v56, %v3433_v55  ;;  %v3924_v50 = vld [vmem:[#allocation11 + $0x84] sm:$0xf0]  ;;  %v3386_v55 = vor.u32 %v3908_v43, %v3385_v42  ;;  %v3446_v56 = vor.u32 %v3921_v44, %v3443_v48  ;;  %v3403_v42 = vld [vmem:[#allocation11 + $0x28] sm:$0xf0] }
 0x127   :  { %v3927_v44 = vld [vmem:[#allocation11 + $0xa4] sm:$0xf] }
 0x128   :  { %1809 = vmatpush.bf16.msrb.mxu0 %v3222_v62  ;;  %v3876_v62 = vld [vmem:[#allocation8 + $0x50c] sm:$0xf] }
 0x129   :  { %1823 = vmatpush.bf16.msrb.mxu1 %v3350_v2  ;;  %1783 = vmatpush.bf16.msra.mxu2 %v2934_v63  ;;  %v3142_v2 = vor.u32 %v3844_v54, %v3139_v59  ;;  %v3498_v63 = vor.u32 %v3936_v61, %v3497_v60  ;;  %v3270_v6 = vor.u32 %v3876_v62, %v3267_v0  ;;  %v3435_v59 = vld [vmem:[#allocation11 + $0x68] sm:$0xf0]  ;;  %v3935_v61 = vld [vmem:[#allocation11 + $0xe4] sm:$0xf] }
 0x12a   :  { %1797 = vmatpush.bf16.msra.mxu3 %v3062_v9  ;;  %v3934_v9 = vld [vmem:[#allocation11 + $0xd4] sm:$0xf0]  ;;  %v3499_v62 = vld [vmem:[#allocation11 + $0xe8] sm:$0xf0] }
 0x12b   :  { %v3490_v12 = vor.u32 %v3934_v9, %v3489_v7  ;;  %v3427_v7 = vld [vmem:[#allocation11 + $0x58] sm:$0xf0]  ;;  %v3502_v9 = vor.u32 %v3935_v61, %v3499_v62 }
 0x12c   :  { %1810 = vmatpush.bf16.msrb.mxu0 %v3206_v11  ;;  %v3916_v11 = vld [vmem:[#allocation11 + $0x44] sm:$0xf0] }
 0x12d   :  { %1824 = vmatpush.bf16.msrb.mxu1 %v3334_v15  ;;  %1784 = vmatpush.bf16.msra.mxu2 %v2918_v18  ;;  %v3932_v15 = vld [vmem:[#allocation11 + $0xc4] sm:$0xf0]  ;;  %v3418_v16 = vor.u32 %v3916_v11, %v3417_v4  ;;  %v3473_v18 = vld [vmem:[#allocation11 + $0xb0] sm:$0xf]  ;;  %v3933_v4 = vld [vmem:[#allocation11 + $0xd4] sm:$0xf] }
 0x12e   :  { %1798 = vmatpush.bf16.msra.mxu3 %v3046_v21  ;;  %v4393_v21 = vld [vmem:[#allocation10] sm:$0xf]  ;;  %v3474_v25 = vor.u32 %v3930_v19, %v3473_v18  ;;  %v3931_v18 = vld [vmem:[#allocation11 + $0xc4] sm:$0xf]  ;;  %v3483_v19 = vld [vmem:[#allocation11 + $0xc8] sm:$0xf0] }
 0x12f   :  { %v531_v30 = vperm.slane %v4393_v21, 0  ;;  %v3491_v11 = vld [vmem:[#allocation11 + $0xd8] sm:$0xf0] }
 0x130   :  { %1811 = vmatpush.bf16.msrb.mxu0 %v3190_v24  ;;  %v3912_v24 = vld [vmem:[#allocation11 + $0x24] sm:$0xf0] }
 0x131   :  { %1825 = vmatpush.bf16.msrb.mxu1 %v3318_v28  ;;  %1785 = vmatpush.bf16.msra.mxu2 %v2902_v31  ;;  %v3465_v28 = vld [vmem:[#allocation11 + $0xa0] sm:$0xf]  ;;  %v3402_v31 = vor.u32 %v3912_v24, %v3401_v23 }
 0x132   :  { %1799 = vmatpush.bf16.msra.mxu3 %v3030_v36  ;;  %v3466_v35 = vor.u32 %v3928_v29, %v3465_v28  ;;  %v3457_v36 = vld [vmem:[#allocation11 + $0x90] sm:$0xf]  ;;  %v3913_v29 = vld [vmem:[#allocation11 + $0x34] sm:$0xf] }
 0x134   :  { %1812 = vmatpush.bf16.msrb.mxu0 %v3174_v41 }
 0x135   :  { %1826 = vmatpush.bf16.msrb.mxu1 %v3302_v45  ;;  %1786 = vmatpush.bf16.msra.mxu2 %v2886_v49  ;;  %v3458_v45 = vor.u32 %v3926_v37, %v3457_v36  ;;  %v3449_v49 = vld [vmem:[#allocation11 + $0x80] sm:$0xf] }
 0x136   :  { %1800 = vmatpush.bf16.msra.mxu3 %v3014_v26  ;;  %v3937_v26 = vld [vmem:[#allocation11 + $0xf4] sm:$0xf] }
 0x138   :  { %1813 = vmatpush.bf16.msrb.mxu0 %v3158_v53  ;;  %1787 = vmatmul.bf16.vlgmr.msra.gmra.mxu2 %v4363_v32  ;;  %v3409_v32 = vld [vmem:[#allocation11 + $0x30] sm:$0xf] }
 0x139   :  { %2237 = vmatpush.bf16.msrb.mxu2 %v3442_v52  ;;  %1827 = vmatpush.bf16.msrb.mxu1 %v3286_v58  ;;  %v3410_v20 = vor.u32 %v3914_v17, %v3409_v32  ;;  %v3507_v52 = vld [vmem:[#allocation11 + $0xf8] sm:$0xf0]  ;;  %v3919_v58 = vld [vmem:[#allocation11 + $0x64] sm:$0xf]  ;;  %v3419_v17 = vld [vmem:[#allocation11 + $0x48] sm:$0xf0] }
 0x13a   :  { %2251 = vmatpush.bf16.msrb.mxu3 %v3506_v57  ;;  %v1508_v22 = vpop.f32.mrf.mxu2  ;;  %v3450_v57 = vor.u32 %v3924_v50, %v3449_v49  ;;  %v3510_v60 = vor.u32 %v3937_v26, %v3507_v52  ;;  %v3438_v3 = vor.u32 %v3919_v58, %v3435_v59  ;;  %v3915_v32 = vld [vmem:[#allocation11 + $0x44] sm:$0xf]  ;;  %v3909_v52 = vld [vmem:[#allocation11 + $0x14] sm:$0xf]  ;;  %v3459_v58 = vld [vmem:[#allocation11 + $0x98] sm:$0xf0] }
 0x13b   :  { %1801 = vmatmul.bf16.vlgmr.msra.gmra.mxu3 %v4365_v38  ;;  %v3482_v38 = vor.u32 %v3932_v15, %v3481_v13  ;;  %v1509_v39 = vadd.f32 %v1508_v22, %v531_v30  ;;  %v532_v22 = vperm.slane %v4393_v21, 1  ;;  %v3422_v24 = vor.u32 %v3915_v32, %v3419_v17  ;;  %v3561_v59 = vld [vmem:[#allocation11 + $0x160] sm:$0xf] }
 0x13c   :  { %1814 = vmatpush.bf16.msrb.mxu0 %v3142_v2  ;;  %v1536_v27 = vpop.f32.mrf.mxu0 }
 0x13d   :  { %2238 = vmatpush.bf16.msrb.mxu2 %v3434_v1  ;;  %1828 = vmatpush.bf16.msrb.mxu1 %v3270_v6  ;;  %v3917_v6 = vld [vmem:[#allocation11 + $0x54] sm:$0xf] }
 0x13e   :  { %2252 = vmatpush.bf16.msrb.mxu3 %v3498_v63  ;;  %v3430_v15 = vor.u32 %v3917_v6, %v3427_v7  ;;  %v3923_v6 = vld [vmem:[#allocation11 + $0x84] sm:$0xf] }
 0x13f   :  { %1815 = vmatmul.bf16.vlgmr.msrb.gmra.mxu0 %v4369_v8  ;;  %v1522_v8 = vpop.f32.mrf.mxu3 }
 0x140   :  { %1829 = vmatmul.bf16.vlgmr.msrb.gmra.mxu1 %v4371_v14  ;;  %v1550_v14 = vpop.f32.mrf.mxu1  ;;  %v1523_v53 = vadd.f32 %v1522_v8, %v1509_v39  ;;  %v3911_v39 = vld [vmem:[#allocation11 + $0x24] sm:$0xf] }
 0x141   :  { %2239 = vmatpush.bf16.msrb.mxu2 %v3426_v10 }
 0x142   :  { %2253 = vmatpush.bf16.msrb.mxu3 %v3490_v12  ;;  %v1510_v41 = vpop.f32.mrf.mxu2  ;;  %v1537_v0 = vadd.f32 %v1536_v27, %v1523_v53  ;;  %v3395_v53 = vld [vmem:[#allocation11 + $0x18] sm:$0xf0] }
 0x143   :  { %v1511_v54 = vadd.f32 %v1510_v41, %v531_v30  ;;  %v3486_v30 = vor.u32 %v3931_v18, %v3483_v19  ;;  %v3948_v18 = vld [vmem:[#allocation11 + $0x144] sm:$0xf0] }
 0x144   :  { %v1538_v47 = vpop.f32.mrf.mxu0  ;;  %v1551_v12 = vadd.f32 %v1550_v14, %v1537_v0  ;;  %v3411_v14 = vld [vmem:[#allocation11 + $0x38] sm:$0xf0] }
 0x145   :  { %2240 = vmatpush.bf16.msrb.mxu2 %v3418_v16  ;;  %v3414_v37 = vor.u32 %v3913_v29, %v3411_v14  ;;  %v3529_v14 = vld [vmem:[#allocation11 + $0x120] sm:$0xf] }
 0x146   :  { %2254 = vmatpush.bf16.msrb.mxu3 %v3482_v38  ;;  %v3494_v38 = vor.u32 %v3933_v4, %v3491_v11  ;;  %v3950_v4 = vld [vmem:[#allocation11 + $0x154] sm:$0xf0] }
 0x147   :  { %v1524_v46 = vpop.f32.mrf.mxu3 }
 0x148   :  { %v1552_v51 = vpop.f32.mrf.mxu1  ;;  %v1525_v1 = vadd.f32 %v1524_v46, %v1511_v54  ;;  %v3569_v46 = vld [vmem:[#allocation11 + $0x170] sm:$0xf] }
 0x149   :  { %2241 = vmatpush.bf16.msrb.mxu2 %v3410_v20 }
 0x14a   :  { %2255 = vmatpush.bf16.msrb.mxu3 %v3474_v25  ;;  %v1564_v2 = vpop.f32.mrf.mxu2  ;;  %v1539_v13 = vadd.f32 %v1538_v47, %v1525_v1  ;;  %v3954_v47 = vld [vmem:[#allocation11 + $0x174] sm:$0xf0]  ;;  %v3398_v1 = vor.u32 %v3909_v52, %v3395_v53  ;;  %v3625_v52 = vld [vmem:[#allocation11 + $0x1e0] sm:$0xf]  ;;  %v3968_v53 = vld [vmem:[#allocation11 + $0x1e4] sm:$0xf0] }
 0x14b   :  { %v1565_v16 = vadd.f32 %v1564_v2, %v1551_v12  ;;  %v3570_v49 = vor.u32 %v3954_v47, %v3569_v46  ;;  %v3633_v47 = vld [vmem:[#allocation11 + $0x1f0] sm:$0xf] }
 0x14c   :  { %v1592_v63 = vpop.f32.mrf.mxu0  ;;  %v1553_v20 = vadd.f32 %v1552_v51, %v1539_v13  ;;  %v3406_v51 = vor.u32 %v3911_v39, %v3403_v42  ;;  %v3940_v42 = vld [vmem:[#allocation11 + $0x104] sm:$0xf0] }
 0x14d   :  { %2242 = vmatpush.bf16.msrb.mxu2 %v3402_v31  ;;  %v3929_v31 = vld [vmem:[#allocation11 + $0xb4] sm:$0xf]  ;;  %v1593_v36 = vadd.f32 %v1592_v63, %v532_v22  ;;  %2265 = vmatpush.bf16.msra.mxu0 %v3570_v49  ;;  %v3951_v49 = vld [vmem:[#allocation11 + $0x164] sm:$0xf] }
 0x14e   :  { %2256 = vmatpush.bf16.msrb.mxu3 %v3466_v35  ;;  %v3478_v43 = vor.u32 %v3929_v31, %v3475_v33 }
 0x14f   :  { %v1578_v5 = vpop.f32.mrf.mxu3 }
 0x150   :  { %v1606_v10 = vpop.f32.mrf.mxu1  ;;  %v1579_v25 = vadd.f32 %v1578_v5, %v1565_v16  ;;  %v3387_v5 = vld [vmem:[#allocation11 + $0x8] sm:$0xf0] }
 0x151   :  { %2243 = vmatpush.bf16.msrb.mxu2 %v3394_v40  ;;  %v1607_v50 = vadd.f32 %v1606_v10, %v1593_v36  ;;  %v3553_v10 = vld [vmem:[#allocation11 + $0x150] sm:$0xf] }
 0x152   :  { %2257 = vmatpush.bf16.msrb.mxu3 %v3458_v45  ;;  %v1566_v23 = vpop.f32.mrf.mxu2  ;;  %v1835_v40 = vmax.f32 %v1579_v25, 0.0  ;;  %v3467_v45 = vld [vmem:[#allocation11 + $0xa8] sm:$0xf0]  ;;  %v3554_v11 = vor.u32 %v3950_v4, %v3553_v10  ;;  %v3946_v25 = vld [vmem:[#allocation11 + $0x134] sm:$0xf0] }
 0x153   :  { %v1567_v8 = vadd.f32 %v1566_v23, %v1553_v20  ;;  %v3470_v54 = vor.u32 %v3927_v44, %v3467_v45  ;;  %v3521_v36 = vld [vmem:[#allocation11 + $0x110] sm:$0xf]  ;;  %v3953_v44 = vld [vmem:[#allocation11 + $0x174] sm:$0xf]  ;;  %v3571_v45 = vld [vmem:[#allocation11 + $0x178] sm:$0xf0] }
 0x154   :  { %v1594_v28 = vpop.f32.mrf.mxu0  ;;  %v3574_v46 = vor.u32 %v3953_v44, %v3571_v45  ;;  %v3962_v10 = vld [vmem:[#allocation11 + $0x1b4] sm:$0xf0]  ;;  %v3635_v44 = vld [vmem:[#allocation11 + $0x1f8] sm:$0xf0] }
 0x155   :  { %2244 = vmatpush.bf16.msrb.mxu2 %v3386_v55  ;;  %v3925_v55 = vld [vmem:[#allocation11 + $0x94] sm:$0xf]  ;;  %v1595_v0 = vadd.f32 %v1594_v28, %v532_v22 }
 0x156   :  { %2258 = vmatpush.bf16.msrb.mxu3 %v3450_v57  ;;  %v3462_v63 = vor.u32 %v3925_v55, %v3459_v58  ;;  %v3626_v55 = vor.u32 %v3968_v53, %v3625_v52  ;;  %v3617_v58 = vld [vmem:[#allocation11 + $0x1d0] sm:$0xf] }
 0x157   :  { %v1580_v27 = vpop.f32.mrf.mxu3 }
 0x158   :  { %v1581_v34 = vadd.f32 %v1580_v27, %v1567_v8  ;;  %v1608_v35 = vpop.f32.mrf.mxu1 }
 0x159   :  { %2293 = vmatpush.bf16.msra.mxu2 %v3446_v56  ;;  %v1609_v12 = vadd.f32 %v1608_v35, %v1595_v0 }
 0x15a   :  { %2307 = vmatpush.bf16.msra.mxu3 %v3510_v60  ;;  %v1839_v41 = vmax.f32 %v1581_v34, 0.0  ;;  %v3952_v60 = vld [vmem:[#allocation11 + $0x164] sm:$0xf0] }
 0x15b   :  { %v1620_v26 = vpop.f32.mrf.mxu2  ;;  %v3562_v62 = vor.u32 %v3952_v60, %v3561_v59  ;;  %v3966_v59 = vld [vmem:[#allocation11 + $0x1d4] sm:$0xf0]  ;;  %v3947_v60 = vld [vmem:[#allocation11 + $0x144] sm:$0xf] }
 0x15c   :  { %v1843_v48 = vpack.c.bf16 %v1839_v41, %v1835_v40  ;;  %v1621_v56 = vadd.f32 %v1620_v26, %v1607_v50  ;;  %v1648_v61 = vpop.f32.mrf.mxu0  ;;  %v3513_v41 = vld [vmem:[#allocation11 + $0x100] sm:$0xf] }
 0x15d   :  { %2294 = vmatpush.bf16.msra.mxu2 %v3438_v3  ;;  %v3907_v3 = vld [vmem:[#allocation11 + $0x4] sm:$0xf]  ;;  %2266 = vmatpush.bf16.msra.mxu0 %v3562_v62  ;;  %v3547_v62 = vld [vmem:[#allocation11 + $0x148] sm:$0xf0] }
 0x15e   :  { %2308 = vmatpush.bf16.msra.mxu3 %v3502_v9  ;;  %2245 = vmatmul.bf16.vlgmr.msrb.gmra.mxu2 %v1843_v48  ;;  %v3451_v9 = vld [vmem:[#allocation11 + $0x88] sm:$0xf0]  ;;  %v3390_v13 = vor.u32 %v3907_v3, %v3387_v5  ;;  %v3609_v3 = vld [vmem:[#allocation11 + $0x1c0] sm:$0xf]  ;;  %v3964_v5 = vld [vmem:[#allocation11 + $0x1c4] sm:$0xf0] }
 0x15f   :  { %v1634_v57 = vpop.f32.mrf.mxu3  ;;  %v3454_v16 = vor.u32 %v3923_v6, %v3451_v9  ;;  %v3610_v6 = vor.u32 %v3964_v5, %v3609_v3  ;;  %v3601_v9 = vld [vmem:[#allocation11 + $0x1b0] sm:$0xf]  ;;  %v3611_v3 = vld [vmem:[#allocation11 + $0x1c8] sm:$0xf0] }
 0x160   :  { %v1662_v2 = vpop.f32.mrf.mxu1  ;;  %v1635_v7 = vadd.f32 %v1634_v57, %v1621_v56  ;;  %v3555_v56 = vld [vmem:[#allocation11 + $0x158] sm:$0xf0] }
 0x161   :  { %2295 = vmatpush.bf16.msra.mxu2 %v3430_v15  ;;  %2267 = vmatpush.bf16.msra.mxu0 %v3554_v11  ;;  %v3943_v11 = vld [vmem:[#allocation11 + $0x124] sm:$0xf] }
 0x162   :  { %2309 = vmatpush.bf16.msra.mxu3 %v3494_v38  ;;  %v1649_v32 = vadd.f32 %v1648_v61, %v1635_v7  ;;  %v3545_v38 = vld [vmem:[#allocation11 + $0x140] sm:$0xf]  ;;  %v3618_v61 = vor.u32 %v3966_v59, %v3617_v58  ;;  %v3539_v7 = vld [vmem:[#allocation11 + $0x138] sm:$0xf0] }
 0x163   :  { %v1622_v15 = vpop.f32.mrf.mxu2  ;;  %v3546_v20 = vor.u32 %v3948_v18, %v3545_v38  ;;  %v3941_v38 = vld [vmem:[#allocation11 + $0x114] sm:$0xf]  ;;  %v3523_v18 = vld [vmem:[#allocation11 + $0x118] sm:$0xf0] }
 0x164   :  { %v1623_v17 = vadd.f32 %v1622_v15, %v1609_v12  ;;  %v1650_v23 = vpop.f32.mrf.mxu0  ;;  %v1663_v8 = vadd.f32 %v1662_v2, %v1649_v32  ;;  %v3531_v12 = vld [vmem:[#allocation11 + $0x128] sm:$0xf0]  ;;  %v3602_v15 = vor.u32 %v3962_v10, %v3601_v9  ;;  %v3593_v32 = vld [vmem:[#allocation11 + $0x1a0] sm:$0xf]  ;;  %v3619_v58 = vld [vmem:[#allocation11 + $0x1d8] sm:$0xf0] }
 0x165   :  { %2296 = vmatpush.bf16.msra.mxu2 %v3422_v24  ;;  %v3537_v24 = vld [vmem:[#allocation11 + $0x130] sm:$0xf]  ;;  %2268 = vmatpush.bf16.msra.mxu0 %v3546_v20  ;;  %v3603_v9 = vld [vmem:[#allocation11 + $0x1b8] sm:$0xf0] }
 0x166   :  { %2310 = vmatpush.bf16.msra.mxu3 %v3486_v30  ;;  %v3538_v28 = vor.u32 %v3946_v25, %v3537_v24  ;;  %v3944_v30 = vld [vmem:[#allocation11 + $0x124] sm:$0xf0]  ;;  %v1836_v33 = vmax.f32 %v1663_v8, 0.0  ;;  %v3526_v24 = vor.u32 %v3941_v38, %v3523_v18 }
 0x167   :  { %v1636_v19 = vpop.f32.mrf.mxu3  ;;  %v3530_v35 = vor.u32 %v3944_v30, %v3529_v14  ;;  %v3958_v14 = vld [vmem:[#allocation11 + $0x194] sm:$0xf0]  ;;  %v3939_v30 = vld [vmem:[#allocation11 + $0x104] sm:$0xf] }
 0x168   :  { %v1637_v22 = vadd.f32 %v1636_v19, %v1623_v17  ;;  %v1664_v29 = vpop.f32.mrf.mxu1  ;;  %v3960_v17 = vld [vmem:[#allocation11 + $0x1a4] sm:$0xf0] }
 0x169   :  { %2297 = vmatpush.bf16.msra.mxu2 %v3414_v37  ;;  %2269 = vmatpush.bf16.msra.mxu0 %v3538_v28  ;;  %v3942_v37 = vld [vmem:[#allocation11 + $0x114] sm:$0xf0]  ;;  %v3594_v20 = vor.u32 %v3960_v17, %v3593_v32 }
 0x16a   :  { %2311 = vmatpush.bf16.msra.mxu3 %v3478_v43  ;;  %v1651_v27 = vadd.f32 %v1650_v23, %v1637_v22  ;;  %v3522_v40 = vor.u32 %v3942_v37, %v3521_v36  ;;  %v3514_v43 = vor.u32 %v3940_v42, %v3513_v41 }
 0x16c   :  { %v1665_v31 = vadd.f32 %v1664_v29, %v1651_v27  ;;  %v3585_v29 = vld [vmem:[#allocation11 + $0x190] sm:$0xf] }
 0x16d   :  { %2298 = vmatpush.bf16.msra.mxu2 %v3406_v51  ;;  %2270 = vmatpush.bf16.msra.mxu0 %v3530_v35  ;;  %v3563_v51 = vld [vmem:[#allocation11 + $0x168] sm:$0xf0] }
 0x16e   :  { %2312 = vmatpush.bf16.msra.mxu3 %v3470_v54  ;;  %v1840_v34 = vmax.f32 %v1665_v31, 0.0  ;;  %v3566_v26 = vor.u32 %v3951_v49, %v3563_v51  ;;  %v3949_v54 = vld [vmem:[#allocation11 + $0x154] sm:$0xf]  ;;  %v3586_v31 = vor.u32 %v3958_v14, %v3585_v29  ;;  %v3627_v51 = vld [vmem:[#allocation11 + $0x1e8] sm:$0xf0] }
 0x16f   :  { %v3558_v57 = vor.u32 %v3949_v54, %v3555_v56 }
 0x170   :  { %v1844_v39 = vpack.c.bf16 %v1840_v34, %v1836_v33  ;;  %v3515_v33 = vld [vmem:[#allocation11 + $0x108] sm:$0xf0] }
 0x171   :  { %2299 = vmatpush.bf16.msra.mxu2 %v3398_v1  ;;  %2271 = vmatpush.bf16.msra.mxu0 %v3522_v40  ;;  %v3550_v1 = vor.u32 %v3947_v60, %v3547_v62  ;;  %v3518_v34 = vor.u32 %v3939_v30, %v3515_v33  ;;  %v3956_v40 = vld [vmem:[#allocation11 + $0x184] sm:$0xf0] }
 0x172   :  { %2313 = vmatpush.bf16.msra.mxu3 %v3462_v63  ;;  %v3945_v63 = vld [vmem:[#allocation11 + $0x134] sm:$0xf] }
 0x173   :  { %2259 = vmatmul.bf16.vlgmr.msrb.gmra.mxu3 %v1844_v39  ;;  %v3542_v4 = vor.u32 %v3945_v63, %v3539_v7  ;;  %v3961_v7 = vld [vmem:[#allocation11 + $0x1b4] sm:$0xf] }
 0x174   :  { %v3606_v10 = vor.u32 %v3961_v7, %v3603_v9 }
 0x175   :  { %2300 = vmatpush.bf16.msra.mxu2 %v3390_v13  ;;  %2272 = vmatpush.bf16.msra.mxu0 %v3514_v43  ;;  %v533_v13 = vperm.slane %v4393_v21, 2  ;;  %v3969_v43 = vld [vmem:[#allocation11 + $0x1f4] sm:$0xf] }
 0x176   :  { %2314 = vmatpush.bf16.msra.mxu3 %v3454_v16  ;;  %v3534_v16 = vor.u32 %v3943_v11, %v3531_v12  ;;  %v3595_v11 = vld [vmem:[#allocation11 + $0x1a8] sm:$0xf0]  ;;  %v534_v12 = vperm.slane %v4393_v21, 3 }
 0x178   :  { %2301 = vmatmul.bf16.vlgmr.msra.gmra.mxu2 %v1843_v48  ;;  %v3970_v48 = vld [vmem:[#allocation11 + $0x1f4] sm:$0xf0] }
 0x179   :  { %2321 = vmatpush.bf16.msrb.mxu0 %v3574_v46  ;;  %v3634_v50 = vor.u32 %v3970_v48, %v3633_v47  ;;  %v3638_v46 = vor.u32 %v3969_v43, %v3635_v44 }
 0x17b   :  { %2279 = vmatpush.bf16.msra.mxu1 %v3634_v50  ;;  %v1676_v0 = vpop.f32.mrf.mxu2  ;;  %v3967_v50 = vld [vmem:[#allocation11 + $0x1e4] sm:$0xf] }
 0x17c   :  { %v1677_v19 = vadd.f32 %v1676_v0, %v533_v13  ;;  %v1704_v22 = vpop.f32.mrf.mxu0  ;;  %v3630_v52 = vor.u32 %v3967_v50, %v3627_v51  ;;  %v3986_v50 = vld [vmem:[#allocation13 + $0x78] sm:$0xff]  ;;  %v3973_v51 = vld [vmem:[#allocation13 + $0x10] sm:$0xff] }
 0x17d   :  { %2322 = vmatpush.bf16.msrb.mxu0 %v3566_v26  ;;  %v1718_v28 = vpop.f32.mrf.mxu1  ;;  %2505 = vmatpush.bf16.msrb.mxu3 %v3986_v50 }
 0x17e   :  { %v1690_v2 = vpop.f32.mrf.mxu3 }
 0x17f   :  { %2280 = vmatpush.bf16.msra.mxu1 %v3626_v55  ;;  %v1691_v8 = vadd.f32 %v1690_v2, %v1677_v19  ;;  %v3963_v2 = vld [vmem:[#allocation11 + $0x1c4] sm:$0xf] }
 0x180   :  { %v3614_v5 = vor.u32 %v3963_v2, %v3611_v3  ;;  %v3955_v19 = vld [vmem:[#allocation11 + $0x184] sm:$0xf] }
 0x181   :  { %2323 = vmatpush.bf16.msrb.mxu0 %v3558_v57  ;;  %v1705_v35 = vadd.f32 %v1704_v22, %v1691_v8  ;;  %v3965_v57 = vld [vmem:[#allocation11 + $0x1d4] sm:$0xf]  ;;  %v3979_v2 = vld [vmem:[#allocation13 + $0x40] sm:$0xff] }
 0x182   :  { %v3622_v60 = vor.u32 %v3965_v57, %v3619_v58  ;;  %v3981_v58 = vld [vmem:[#allocation13 + $0x50] sm:$0xff] }
 0x183   :  { %2315 = vmatmul.bf16.vlgmr.msra.gmra.mxu3 %v1844_v39  ;;  %2281 = vmatpush.bf16.msra.mxu1 %v3618_v61  ;;  %v1678_v23 = vpop.f32.mrf.mxu2  ;;  %v3577_v39 = vld [vmem:[#allocation11 + $0x180] sm:$0xf]  ;;  %v1719_v47 = vadd.f32 %v1718_v28, %v1705_v35 }
 0x184   :  { %v1679_v27 = vadd.f32 %v1678_v23, %v533_v13  ;;  %v3578_v42 = vor.u32 %v3956_v40, %v3577_v39  ;;  %v1706_v45 = vpop.f32.mrf.mxu0 }
 0x185   :  { %2324 = vmatpush.bf16.msrb.mxu0 %v3550_v1  ;;  %v1720_v26 = vpop.f32.mrf.mxu1 }
 0x186   :  { %v1692_v25 = vpop.f32.mrf.mxu3 }
 0x187   :  { %2282 = vmatpush.bf16.msra.mxu1 %v3610_v6  ;;  %v1693_v36 = vadd.f32 %v1692_v25, %v1679_v27 }
 0x189   :  { %2325 = vmatpush.bf16.msrb.mxu0 %v3542_v4  ;;  %v1707_v48 = vadd.f32 %v1706_v45, %v1693_v36  ;;  %v3959_v4 = vld [vmem:[#allocation11 + $0x1a4] sm:$0xf]  ;;  %v3978_v45 = vld [vmem:[#allocation13 + $0x38] sm:$0xff] }
 0x18a   :  { %v3598_v13 = vor.u32 %v3959_v4, %v3595_v11  ;;  %2491 = vmatpush.bf16.msrb.mxu2 %v3978_v45 }
 0x18b   :  { %2283 = vmatpush.bf16.msra.mxu1 %v3602_v15  ;;  %v1721_v53 = vadd.f32 %v1720_v26, %v1707_v48  ;;  %v3957_v15 = vld [vmem:[#allocation11 + $0x194] sm:$0xf]  ;;  %v3975_v48 = vld [vmem:[#allocation13 + $0x20] sm:$0xff] }
 0x18c   :  { %v3985_v26 = vld [vmem:[#allocation13 + $0x70] sm:$0xff] }
 0x18d   :  { %2326 = vmatpush.bf16.msrb.mxu0 %v3534_v16  ;;  %v3587_v16 = vld [vmem:[#allocation11 + $0x198] sm:$0xf0]  ;;  %2506 = vmatpush.bf16.msrb.mxu3 %v3985_v26 }
 0x18e   :  { %v3590_v38 = vor.u32 %v3957_v15, %v3587_v16 }
 0x18f   :  { %2284 = vmatpush.bf16.msra.mxu1 %v3594_v20  ;;  %v3579_v20 = vld [vmem:[#allocation11 + $0x188] sm:$0xf0] }
 0x190   :  { %v3582_v23 = vor.u32 %v3955_v19, %v3579_v20 }
 0x191   :  { %2327 = vmatpush.bf16.msrb.mxu0 %v3526_v24 }
 0x193   :  { %2285 = vmatpush.bf16.msra.mxu1 %v3586_v31 }
 0x195   :  { %2328 = vmatpush.bf16.msrb.mxu0 %v3518_v34 }
 0x197   :  { %2286 = vmatpush.bf16.msra.mxu1 %v3578_v42 }
 0x19b   :  { %v1732_v37 = vpop.f32.mrf.mxu2  ;;  %2335 = vmatpush.bf16.msrb.mxu1 %v3638_v46  ;;  %v3977_v46 = vld [vmem:[#allocation13 + $0x30] sm:$0xff] }
 0x19c   :  { %v1733_v49 = vadd.f32 %v1732_v37, %v1719_v47  ;;  %v1760_v0 = vpop.f32.mrf.mxu0  ;;  %2492 = vmatpush.bf16.msrb.mxu2 %v3977_v46  ;;  %v3976_v47 = vld [vmem:[#allocation13 + $0x28] sm:$0xff] }
 0x19d   :  { %v1774_v63 = vpop.f32.mrf.mxu1  ;;  %v1761_v17 = vadd.f32 %v1760_v0, %v534_v12  ;;  %v3980_v0 = vld [vmem:[#allocation13 + $0x48] sm:$0xff] }
 0x19e   :  { %v1746_v41 = vpop.f32.mrf.mxu3 }
 0x19f   :  { %2336 = vmatpush.bf16.msrb.mxu1 %v3630_v52  ;;  %v1747_v55 = vadd.f32 %v1746_v41, %v1733_v49  ;;  %v1775_v22 = vadd.f32 %v1774_v63, %v1761_v17  ;;  %v3974_v49 = vld [vmem:[#allocation13 + $0x18] sm:$0xff]  ;;  %v3972_v52 = vld [vmem:[#allocation13 + $0x8] sm:$0xff] }
 0x1a0   :  { %2493 = vmatpush.bf16.msrb.mxu2 %v3976_v47 }
 0x1a1   :  { %v1837_v62 = vmax.f32 %v1747_v55, 0.0  ;;  %v3983_v55 = vld [vmem:[#allocation13 + $0x60] sm:$0xff] }
 0x1a3   :  { %v1734_v54 = vpop.f32.mrf.mxu2  ;;  %2337 = vmatpush.bf16.msrb.mxu1 %v3622_v60 }
 0x1a4   :  { %v1735_v56 = vadd.f32 %v1734_v54, %v1721_v53  ;;  %v1762_v32 = vpop.f32.mrf.mxu0  ;;  %2494 = vmatpush.bf16.msrb.mxu2 %v3975_v48  ;;  %v3984_v53 = vld [vmem:[#allocation13 + $0x68] sm:$0xff]  ;;  %v3971_v54 = vld [vmem:[#allocation13] sm:$0xff] }
 0x1a5   :  { %v1776_v18 = vpop.f32.mrf.mxu1  ;;  %v1763_v28 = vadd.f32 %v1762_v32, %v534_v12  ;;  %2507 = vmatpush.bf16.msrb.mxu3 %v3984_v53 }
 0x1a6   :  { %v1748_v59 = vpop.f32.mrf.mxu3 }
 0x1a7   :  { %v1749_v61 = vadd.f32 %v1748_v59, %v1735_v56  ;;  %2338 = vmatpush.bf16.msrb.mxu1 %v3614_v5  ;;  %v1777_v14 = vadd.f32 %v1776_v18, %v1763_v28  ;;  %v3982_v56 = vld [vmem:[#allocation13 + $0x58] sm:$0xff]  ;;  %v1911_v59 = vld [vmem:[%s4423_s6] sm:$0x3]  ;;  %s4248_s6 = smov [#allocation15]  }
 0x1a8   :  { %2495 = vmatpush.bf16.msrb.mxu2 %v3974_v49  ;;  %v1914_v15 = vperm.slane %v1911_v59, 1  ;;  %s2538_s11 = sshll.u32 %s4248_s6, 4  ;;  %s2539_s11 = int_to_ptr.vmem [resolvable:$true] %s2538_s11 }
 0x1a9   :  { %v1841_v1 = vmax.f32 %v1749_v61, 0.0  ;;  %2508 = vmatpush.bf16.msrb.mxu3 %v3983_v55 }
 0x1ab   :  { %v1845_v6 = vpack.c.bf16 %v1841_v1, %v1837_v62  ;;  %2339 = vmatpush.bf16.msrb.mxu1 %v3606_v10  ;;  %v1913_v62 = vperm.slane %v1911_v59, 0 }
 0x1ac   :  { %2496 = vmatpush.bf16.msrb.mxu2 %v3973_v51 }
 0x1ad   :  { %2273 = vmatmul.bf16.vlgmr.msra.gmra.mxu0 %v1845_v6  ;;  %2509 = vmatpush.bf16.msrb.mxu3 %v3982_v56 }
 0x1af   :  { %2340 = vmatpush.bf16.msrb.mxu1 %v3598_v13 }
 0x1b0   :  { %2497 = vmatpush.bf16.msrb.mxu2 %v3972_v52 }
 0x1b1   :  { %2510 = vmatpush.bf16.msrb.mxu3 %v3981_v58 }
 0x1b3   :  { %2341 = vmatpush.bf16.msrb.mxu1 %v3590_v38 }
 0x1b4   :  { %2498 = vmatpush.bf16.msrb.mxu2 %v3971_v54 }
 0x1b5   :  { %2511 = vmatpush.bf16.msrb.mxu3 %v3980_v0 }
 0x1b7   :  { %2342 = vmatpush.bf16.msrb.mxu1 %v3582_v23 }
 0x1b9   :  { %2512 = vmatpush.bf16.msrb.mxu3 %v3979_v2 }
 0x1bb   :  { %v1788_v24 = vpop.f32.mrf.mxu2 }
 0x1bc   :  { %v1789_v25 = vadd.f32 %v1788_v24, %v1775_v22  ;;  %v1816_v27 = vpop.f32.mrf.mxu0 }
 0x1bd   :  { %v1830_v21 = vpop.f32.mrf.mxu1  ;;  %2329 = vmatmul.bf16.vlgmr.msrb.gmra.mxu0 %v1845_v6 }
 0x1be   :  { %v1802_v8 = vpop.f32.mrf.mxu3 }
 0x1bf   :  { %v1803_v29 = vadd.f32 %v1802_v8, %v1789_v25 }
 0x1c1   :  { %v1817_v31 = vadd.f32 %v1816_v27, %v1803_v29 }
 0x1c3   :  { %v1790_v30 = vpop.f32.mrf.mxu2  ;;  %v1831_v37 = vadd.f32 %v1830_v21, %v1817_v31 }
 0x1c4   :  { %v1791_v33 = vadd.f32 %v1790_v30, %v1777_v14  ;;  %v1818_v36 = vpop.f32.mrf.mxu0 }
 0x1c5   :  { %v1832_v40 = vpop.f32.mrf.mxu1  ;;  %v1838_v42 = vmax.f32 %v1831_v37, 0.0 }
 0x1c6   :  { %v1804_v34 = vpop.f32.mrf.mxu3 }
 0x1c7   :  { %v1805_v35 = vadd.f32 %v1804_v34, %v1791_v33 }
 0x1c9   :  { %v1819_v39 = vadd.f32 %v1818_v36, %v1805_v35 }
 0x1cb   :  { %v1833_v41 = vadd.f32 %v1832_v40, %v1819_v39  ;;  %v4004_v39 = vld [vmem:[%s4425_s8] ss:$0 sm:$0xff] }
 0x1cd   :  { %v1842_v43 = vmax.f32 %v1833_v41, 0.0 }
 0x1cf   :  { %v1846_v44 = vpack.c.bf16 %v1842_v43, %v1838_v42 }
 0x1d1   :  { %2287 = vmatmul.bf16.vlgmr.msra.gmra.mxu1 %v1846_v44 }
 0x1e1   :  { %2343 = vmatmul.bf16.vlgmr.msrb.gmra.mxu1 %v1846_v44  ;;  %v2246_v57 = vpop.f32.mrf.mxu2 }
 0x1e2   :  { %v2247_v1 = vadd.f32 %v2246_v57, %v1913_v62 }
 0x1e9   :  { %v2248_v3 = vpop.f32.mrf.mxu2 }
 0x1ea   :  { %v2249_v4 = vadd.f32 %v2248_v3, %v1913_v62 }
 0x1f6   :  { %v2260_v60 = vpop.f32.mrf.mxu3 }
 0x1f7   :  { %v2261_v5 = vadd.f32 %v2260_v60, %v2247_v1 }
 0x1fb   :  { %v2302_v13 = vpop.f32.mrf.mxu2 }
 0x1fc   :  { %v2303_v19 = vadd.f32 %v2302_v13, %v1914_v15 }
 0x1fe   :  { %v2262_v63 = vpop.f32.mrf.mxu3 }
 0x1ff   :  { %v2263_v12 = vadd.f32 %v2262_v63, %v2249_v4 }
 0x203   :  { %v2304_v25 = vpop.f32.mrf.mxu2 }
 0x204   :  { %v2305_v21 = vadd.f32 %v2304_v25, %v1914_v15 }
 0x206   :  { %v2316_v32 = vpop.f32.mrf.mxu3 }
 0x207   :  { %v2317_v22 = vadd.f32 %v2316_v32, %v2303_v19 }
 0x20e   :  { %v2318_v28 = vpop.f32.mrf.mxu3 }
 0x20f   :  { %v2319_v30 = vadd.f32 %v2318_v28, %v2305_v21 }
 0x22a   :  { %v2274_v61 = vpop.f32.mrf.mxu0 }
 0x22b   :  { %v2275_v6 = vadd.f32 %v2274_v61, %v2261_v5 }
 0x232   :  { %v2276_v7 = vpop.f32.mrf.mxu0 }
 0x233   :  { %v2277_v16 = vadd.f32 %v2276_v7, %v2263_v12 }
 0x23a   :  { %v2330_v18 = vpop.f32.mrf.mxu0 }
 0x23b   :  { %v2331_v24 = vadd.f32 %v2330_v18, %v2317_v22 }
 0x242   :  { %v2332_v14 = vpop.f32.mrf.mxu0 }
 0x243   :  { %v2333_v31 = vadd.f32 %v2332_v14, %v2319_v30 }
 0x24e   :  { %v2288_v9 = vpop.f32.mrf.mxu1 }
 0x24f   :  { %v2289_v10 = vadd.f32 %v2288_v9, %v2275_v6 }
 0x251   :  { %v2349_v11 = vmax.f32 %v2289_v10, 0.0 }
 0x253   :  { %2353 = vst [vmem:[#allocation15] sm:$0xff] %v2349_v11 }
 0x256   :  { %v2290_v17 = vpop.f32.mrf.mxu1 }
 0x257   :  { %v2291_v38 = vadd.f32 %v2290_v17, %v2277_v16 }
 0x259   :  { %v2351_v20 = vmax.f32 %v2291_v38, 0.0 }
 0x25b   :  { %2355 = vst [vmem:[#allocation15 + $0x10] sm:$0xff] %v2351_v20  ;;  %v2357_v23 = vpack.c.bf16 %v2351_v20, %v2349_v11 }
 0x25d   :  { %2499 = vmatmul.bf16.vlgmr.msrb.gmra.mxu2 %v2357_v23 }
 0x25e   :  { %v2344_v8 = vpop.f32.mrf.mxu1 }
 0x25f   :  { %v2345_v27 = vadd.f32 %v2344_v8, %v2331_v24 }
 0x261   :  { %v2350_v29 = vmax.f32 %v2345_v27, 0.0 }
 0x263   :  { %2354 = vst [vmem:[#allocation15 + $0x8] sm:$0xff] %v2350_v29 }
 0x266   :  { %v2346_v33 = vpop.f32.mrf.mxu1 }
 0x267   :  { %v2347_v34 = vadd.f32 %v2346_v33, %v2333_v31 }
 0x269   :  { %v2352_v35 = vmax.f32 %v2347_v34, 0.0 }
 0x26b   :  { %2356 = vst [vmem:[#allocation15 + $0x18] sm:$0xff] %v2352_v35  ;;  %v2358_v36 = vpack.c.bf16 %v2352_v35, %v2350_v29 }
 0x26c   :  { %2546 = dma.vmem_to_hbm [thread:$0]  %s2539_s11, 512, %s2541_s16, [#allocation16], %s4237_s25, %s4237_s25, %s4238_s26  }
 0x26d   :  { %2513 = vmatmul.bf16.vlgmr.msrb.gmra.mxu3 %v2358_v36 }
 0x2e0   :  { %v2500_v37 = vpop.f32.mrf.mxu2 }
 0x2e1   :  { %v2501_v40 = vadd.f32 %v4004_v39, %v2500_v37 }
 0x2e8   :  { %v2502_v43 = vpop.f32.mrf.mxu2 }
 0x2e9   :  { %v2503_v44 = vadd.f32 %v4004_v39, %v2502_v43 }
 0x2f0   :  { %v2514_v41 = vpop.f32.mrf.mxu3 }
 0x2f1   :  { %v2515_v42 = vadd.f32 %v2514_v41, %v2501_v40 }
 0x2f3   :  { %2519 = vst [vmem:[#allocation14] sm:$0xff] %v2515_v42 }
 0x2f8   :  { %v2516_v45 = vpop.f32.mrf.mxu3 }
 0x2f9   :  { %v2517_v46 = vadd.f32 %v2516_v45, %v2503_v44 }
 0x2fb   :  { %2520 = vst [vmem:[#allocation14 + $0x8] sm:$0xff] %v2517_v46 }
 0x2fc   :  { %2533 = dma.vmem_to_hbm [thread:$0]  %s2526_s0, 256, %s2528_s20, [#allocation4], %s4240_s13, %s4240_s13, %s4241_s14  }
 0x2fd   :  { %4229 = dma.done.wait [#allocation4], 256  }
 0x2fe   :  { %4230 = vsyncadd [#allocation4], 4294967040 }
 0x2ff   :  { %4231 = dma.done.wait [#allocation16], 512  }
 0x300   :  { %4232 = vsyncadd [#allocation16], 4294966784 }
 0x301   :  { %2555 = vsyncpa [#allocation3], 1 }
 0x302   :  { %2556 = vsyncpa [#allocation6], 1 }
 0x303   :  { %2557 = vsyncpa [#allocation9], 1 }
 0x304   :  { %2558 = vsyncpa [#allocation12], 1 }
 0x305   :  { %2559 = vsyncpa [#allocation4], 1 }
 0x306   :  { %2560 = vsyncpa [#allocation16], 1 }

</bundles_post_ra>
